<compile_context>
chip_gen: v5e
topology: v5e:2x2
jax: 0.10.0
libtpu: 0.0.40
codegen_flags: <defaults>
</compile_context>

<pallas_src>
import math
import numpy as np
import jax
import jax.numpy as jnp
from jax import lax
from jax.experimental import pallas as pl
from jax.experimental.pallas import tpu as pltpu

# ----- small config (consistent with the module: d_ff = 4*d_model, t == context_length) -----
B = 2
T = 16          # context_length
D = 128         # d_model
N_HEADS = 4
H = D // N_HEADS
D_FF = 4 * D
EPS = 1e-8


def _rmsnorm(v, g):
    rms = jnp.sqrt(jnp.mean(v * v, axis=-1, keepdims=True))
    return (v / (rms + EPS)) * g


# --------------------------------- the fused decoder-layer kernel ---------------------------------
def decoder_layer_kernel(x_ref, g1_ref, wbig_ref, cos_ref, sin_ref,
                         g2_ref, w1_ref, w2_ref, o_ref):
    bb = x_ref.shape[0]            # batch elements handled in this grid step (static)
    R = bb * T                     # rows fed to the MXU

    x3 = x_ref[...]                                  # (bb, T, D)
    x = x3.reshape(R, D)                             # leading-dim flatten: free

    # ---- RMSNorm 1 ----
    xn = _rmsnorm(x, g1_ref[0])

    # ---- fused projection: [q, q@P, k, k@P, v] in ONE wide MXU matmul ----
    proj = jnp.dot(xn, wbig_ref[...], preferred_element_type=jnp.float32)    # (R, 5*D)
    q = proj[:, 0 * D:1 * D]
    qP = proj[:, 1 * D:2 * D]
    k = proj[:, 2 * D:3 * D]
    kP = proj[:, 3 * D:4 * D]
    v = proj[:, 4 * D:5 * D]

    # ---- RoPE: pure VPU (rotate_half already folded into Wq@P / Wk@P on the host) ----
    cos = cos_ref[...]                                # (R, D)
    sin = sin_ref[...]
    q_rot = q * cos + qP * sin
    k_rot = k * cos + kP * sin

    # ---- causal multi-head attention: one batched dot_general over (head, batch) groups ----
    def heads(a2d):  # (R, D) -> (N_HEADS*bb, T, H); group index g = head*bb + batch
        return jnp.concatenate(
            [a2d[:, i * H:(i + 1) * H].reshape(bb, T, H) for i in range(N_HEADS)], axis=0)

    qh, kh, vh = heads(q_rot), heads(k_rot), heads(v)

    scale = 1.0 / math.sqrt(H)
    row = lax.broadcasted_iota(jnp.int32, (T, T), 0)   # built once, reused for every group
    col = lax.broadcasted_iota(jnp.int32, (T, T), 1)
    causal = row >= col

    s = jnp.einsum('gth,gsh->gts', qh, kh, preferred_element_type=jnp.float32) * scale
    s = jnp.where(causal, s, -jnp.inf)
    m = jnp.max(s, axis=-1, keepdims=True)
    e = jnp.exp(s - m)
    p = e * pl.reciprocal(jnp.sum(e, axis=-1, keepdims=True), approx=True)
    oh = jnp.einsum('gts,gsh->gth', p, vh, preferred_element_type=jnp.float32)   # (G, T, H)

    # reassemble heads along the lane axis -> (bb, T, D)
    attn = jnp.concatenate([oh[i * bb:(i + 1) * bb] for i in range(N_HEADS)], axis=-1)

    # ---- residual 1 ----
    x1 = (attn + x3).reshape(R, D)

    # ---- RMSNorm 2 + FFN (ReLU^2) ----
    xn2 = _rmsnorm(x1, g2_ref[0])
    h1 = jnp.dot(xn2, w1_ref[...], preferred_element_type=jnp.float32)       # (R, 4D)
    r = jnp.maximum(h1, 0.0)
    ff = jnp.dot(r * r, w2_ref[...], preferred_element_type=jnp.float32)     # (R, D)

    # ---- residual 2 ----
    o_ref[...] = (ff + x1).reshape(bb, T, D)


# ------------------------------------------- wrapper -------------------------------------------
def _default_batch_per_step():
    # Multi-TensorCore chips (v7x; v4/v5p megacore): keep one batch element per grid step so the
    # "parallel" batch axis is sharded across cores.  Single-TC chips (v5e/v6e): fuse the whole
    # batch into one grid step (better MXU fill, no per-step overhead).
    try:
        kind = jax.devices()[0].device_kind.lower()
    except Exception:
        return B
    if any(t in kind for t in ("v7", "tpu7", "7x", "v4", "v5p")):
        return 1
    return B


def decoder_layer_pallas(x, params, batch_per_step=None):
    g1, wq, wk, wv, cos, sin, rotp, g2, w1, w2 = params
    bb = _default_batch_per_step() if batch_per_step is None else batch_per_step
    assert B % bb == 0

    # Host-side fusion: fold rotate_half (x @ P) into the projection weights and build one wide
    # (D, 5D) weight so the kernel issues a single projection matmul.
    wbig = jnp.concatenate([wq, wq @ rotp, wk, wk @ rotp, wv], axis=1)       # (D, 5D)
    cos_b = jnp.tile(cos, (bb, 1))                                           # (bb*T, D)
    sin_b = jnp.tile(sin, (bb, 1))

    flops = (2 * B * T * D * (5 * D)                 # fused q/qP/k/kP/v projection
             + 2 * 2 * B * N_HEADS * T * T * H       # scores + p@v
             + 2 * 2 * B * T * D * D_FF)             # FFN w1 + w2
    transcendentals = B * N_HEADS * T * T + 4 * B * T
    bytes_accessed = 4 * (2 * x.size + wbig.size + w1.size + w2.size
                          + cos_b.size + sin_b.size + g1.size + g2.size)

    # NOTE: weight/table specs are grid-invariant; pl.Buffered(1) would halve their VMEM
    # footprint, but total residency is ~1 MiB here so the default buffering is kept.
    full2d = lambda arr: pl.BlockSpec(arr.shape, lambda b: (0, 0))

    return pl.pallas_call(
        decoder_layer_kernel,
        out_shape=jax.ShapeDtypeStruct((B, T, D), jnp.float32),
        grid_spec=pltpu.PrefetchScalarGridSpec(
            num_scalar_prefetch=0,
            grid=(B // bb,),
            in_specs=[
                pl.BlockSpec((bb, T, D), lambda b: (b, 0, 0)),   # x
                full2d(g1), full2d(wbig), full2d(cos_b), full2d(sin_b),
                full2d(g2), full2d(w1), full2d(w2),
            ],
            out_specs=pl.BlockSpec((bb, T, D), lambda b: (b, 0, 0)),
        ),
        compiler_params=pltpu.CompilerParams(dimension_semantics=("parallel",)),
        cost_estimate=pl.CostEstimate(flops=flops, transcendentals=transcendentals,
                                      bytes_accessed=bytes_accessed),
    )(x, g1, wbig, cos_b, sin_b, g2, w1, w2)


# --------------------- parameter construction (deterministic, synthetic) ---------------------
def make_params(key):
    kq, kk, kv, k1, k2 = jax.random.split(key, 5)
    scale = 0.02
    wq = jax.random.normal(kq, (D, D), jnp.float32) * scale     # stored as (in, out)
    wk = jax.random.normal(kk, (D, D), jnp.float32) * scale
    wv = jax.random.normal(kv, (D, D), jnp.float32) * scale
    w1 = jax.random.normal(k1, (D, D_FF), jnp.float32) * scale
    w2 = jax.random.normal(k2, (D_FF, D), jnp.float32) * scale
    g1 = jnp.ones((1, D), jnp.float32)                          # RMSNorm gains init to ones
    g2 = jnp.ones((1, D), jnp.float32)

    # rotary tables (see TODO(synk) above regarding the original repeat)
    inv_freq = 1.0 / (10000.0 ** (jnp.arange(0, D, 2, dtype=jnp.float32) / D))
    pos = jnp.arange(T, dtype=jnp.float32)
    sinusoid = jnp.einsum("i,j->ij", pos, inv_freq)              # (T, D/2)
    cos = jnp.tile(jnp.cos(sinusoid), (1, 2))                    # (T, D)
    sin = jnp.tile(jnp.sin(sinusoid), (1, 2))

    # signed permutation matrix implementing rotate_half:  rot = x @ P  (host-side only now)
    Pm = np.zeros((D, D), np.float32)
    for j in range(D // 2):
        Pm[2 * j + 1, j] = -1.0          # rot[j]        = -x[2j+1]
    for j in range(D // 2, D):
        Pm[2 * (j - D // 2), j] = 1.0    # rot[j]        =  x[2(j - D/2)]
    rotp = jnp.asarray(Pm)

    return (g1, wq, wk, wv, cos, sin, rotp, g2, w1, w2)


# --------------------- pure-JAX reference (mirrors the PyTorch forward) ---------------------
def _rotate_half_ref(x):
    xr = x.reshape(*x.shape[:-1], -1, 2)
    x1, x2 = xr[..., 0], xr[..., 1]
    return jnp.concatenate([-x2, x1], axis=-1)


def decoder_layer_ref(x, params):
    g1, wq, wk, wv, cos, sin, _rotp, g2, w1, w2 = params

    xn = _rmsnorm(x, g1[0])
    q = xn @ wq
    k = xn @ wk
    v = xn @ wv
    q = q * cos + _rotate_half_ref(q) * sin
    k = k * cos + _rotate_half_ref(k) * sin

    def split(a):   # (B,T,D) -> (B,n,T,h)
        return a.reshape(B, T, N_HEADS, H).transpose(0, 2, 1, 3)

    qh, kh, vh = split(q), split(k), split(v)
    s = jnp.einsum("bnth,bnsh->bnts", qh, kh) / math.sqrt(H)
    mask = np.tril(np.ones((T, T), bool))
    s = jnp.where(mask, s, -jnp.inf)
    p = jax.nn.softmax(s, axis=-1)
    attn = jnp.einsum("bnts,bnsh->bnth", p, vh).transpose(0, 2, 1, 3).reshape(B, T, D)

    x1 = attn + x
    xn2 = _rmsnorm(x1, g2[0])
    h1 = xn2 @ w1
    r = jnp.maximum(h1, 0.0)
    ff = (r * r) @ w2
    return ff + x1


if __name__ == "__main__":
    key = jax.random.PRNGKey(0)
    kp, kx = jax.random.split(key)
    params = make_params(kp)
    x = jax.random.normal(kx, (B, T, D), jnp.float32)

    out = jax.block_until_ready(decoder_layer_pallas(x, params))

    ref = decoder_layer_ref(x, params)
    # tolerance relaxed slightly (2e-3) to accommodate the EUP approximate reciprocal in the
    # softmax denominator; matmuls stay in f32 to preserve the reference semantics.
    np.testing.assert_allclose(np.asarray(out), np.asarray(ref), rtol=2e-3, atol=2e-3)

    print("KERNEL_OK")
</pallas_src>

<mosaic_0001>
module attributes {stable_mosaic.version = 11 : i64} {
  func.func @decoder_layer_kernel(%arg0: i32, %arg1: memref<2x16x128xf32, #tpu.memory_space<vmem>>, %arg2: memref<1x128xf32, #tpu.memory_space<vmem>>, %arg3: memref<128x640xf32, #tpu.memory_space<vmem>>, %arg4: memref<32x128xf32, #tpu.memory_space<vmem>>, %arg5: memref<32x128xf32, #tpu.memory_space<vmem>>, %arg6: memref<1x128xf32, #tpu.memory_space<vmem>>, %arg7: memref<128x512xf32, #tpu.memory_space<vmem>>, %arg8: memref<512x128xf32, #tpu.memory_space<vmem>>, %arg9: memref<2x16x128xf32, #tpu.memory_space<vmem>>) attributes {dimension_semantics = [#tpu.dimension_semantics<parallel>], iteration_bounds = array<i64: 1>, scalar_prefetch = 0 : i64, scratch_operands = 0 : i64, tpu.core_type = #tpu.core_type<tc>, window_params = [{transform_indices = @transform_0, window_bounds = array<i64: 2, 16, 128>}, {pipeline_mode = #tpu.pipeline_mode<synchronous>, transform_indices = @transform_1, window_bounds = array<i64: 1, 128>}, {pipeline_mode = #tpu.pipeline_mode<synchronous>, transform_indices = @transform_2, window_bounds = array<i64: 128, 640>}, {pipeline_mode = #tpu.pipeline_mode<synchronous>, transform_indices = @transform_3, window_bounds = array<i64: 32, 128>}, {pipeline_mode = #tpu.pipeline_mode<synchronous>, transform_indices = @transform_4, window_bounds = array<i64: 32, 128>}, {pipeline_mode = #tpu.pipeline_mode<synchronous>, transform_indices = @transform_5, window_bounds = array<i64: 1, 128>}, {pipeline_mode = #tpu.pipeline_mode<synchronous>, transform_indices = @transform_6, window_bounds = array<i64: 128, 512>}, {pipeline_mode = #tpu.pipeline_mode<synchronous>, transform_indices = @transform_7, window_bounds = array<i64: 512, 128>}, {transform_indices = @transform_8, window_bounds = array<i64: 2, 16, 128>}]} {
    %c0 = arith.constant 0 : index
    %c0_0 = arith.constant 0 : index
    %c0_1 = arith.constant 0 : index
    %0 = vector.load %arg1[%c0, %c0_0, %c0_1] : memref<2x16x128xf32, #tpu.memory_space<vmem>>, vector<2x16x128xf32>
    %1 = vector.shape_cast %0 : vector<2x16x128xf32> to vector<32x128xf32>
    %c0_2 = arith.constant 0 : index
    %c0_3 = arith.constant 0 : index
    %2 = vector.load %arg2[%c0_2, %c0_3] : memref<1x128xf32, #tpu.memory_space<vmem>>, vector<1x128xf32>
    %3 = vector.shape_cast %2 : vector<1x128xf32> to vector<128xf32>
    %4 = arith.mulf %1, %1 : vector<32x128xf32>
    %cst = arith.constant dense<0.000000e+00> : vector<32xf32>
    %5 = vector.multi_reduction <add>, %4, %cst [1] : vector<32x128xf32> to vector<32xf32>
    %6 = vector.shape_cast %5 : vector<32xf32> to vector<32x1xf32>
    %cst_4 = arith.constant 1.280000e+02 : f32
    %7 = vector.broadcast %cst_4 : f32 to vector<32x1xf32>
    %8 = arith.divf %6, %7 : vector<32x1xf32>
    %9 = math.sqrt %8 : vector<32x1xf32>
    %cst_5 = arith.constant 9.99999993E-9 : f32
    %10 = vector.broadcast %cst_5 : f32 to vector<32x1xf32>
    %11 = arith.addf %9, %10 : vector<32x1xf32>
    %12 = vector.broadcast %11 : vector<32x1xf32> to vector<32x128xf32>
    %13 = arith.divf %1, %12 : vector<32x128xf32>
    %14 = vector.shape_cast %3 : vector<128xf32> to vector<1x128xf32>
    %15 = vector.broadcast %14 : vector<1x128xf32> to vector<32x128xf32>
    %16 = arith.mulf %13, %15 : vector<32x128xf32>
    %c0_6 = arith.constant 0 : index
    %c0_7 = arith.constant 0 : index
    %17 = vector.load %arg3[%c0_6, %c0_7] : memref<128x640xf32, #tpu.memory_space<vmem>>, vector<128x640xf32>
    %cst_8 = arith.constant dense<0.000000e+00> : vector<32x640xf32>
    %18 = tpu.matmul %16, %17, %cst_8 {dimension_numbers = #tpu.dot_dimension_numbers<[1], [0], [0], [1], [0, 0, 1, 1], [], []>} : vector<32x128xf32>, vector<128x640xf32>, vector<32x640xf32> -> vector<32x640xf32>
    %19 = vector.extract_strided_slice %18 {offsets = [0, 0], sizes = [32, 128], strides = [1, 1]} : vector<32x640xf32> to vector<32x128xf32>
    %20 = vector.extract_strided_slice %18 {offsets = [0, 128], sizes = [32, 128], strides = [1, 1]} : vector<32x640xf32> to vector<32x128xf32>
    %21 = vector.extract_strided_slice %18 {offsets = [0, 256], sizes = [32, 128], strides = [1, 1]} : vector<32x640xf32> to vector<32x128xf32>
    %22 = vector.extract_strided_slice %18 {offsets = [0, 384], sizes = [32, 128], strides = [1, 1]} : vector<32x640xf32> to vector<32x128xf32>
    %23 = vector.extract_strided_slice %18 {offsets = [0, 512], sizes = [32, 128], strides = [1, 1]} : vector<32x640xf32> to vector<32x128xf32>
    %c0_9 = arith.constant 0 : index
    %c0_10 = arith.constant 0 : index
    %24 = vector.load %arg4[%c0_9, %c0_10] : memref<32x128xf32, #tpu.memory_space<vmem>>, vector<32x128xf32>
    %c0_11 = arith.constant 0 : index
    %c0_12 = arith.constant 0 : index
    %25 = vector.load %arg5[%c0_11, %c0_12] : memref<32x128xf32, #tpu.memory_space<vmem>>, vector<32x128xf32>
    %26 = arith.mulf %19, %24 : vector<32x128xf32>
    %27 = arith.mulf %20, %25 : vector<32x128xf32>
    %28 = arith.addf %26, %27 : vector<32x128xf32>
    %29 = arith.mulf %21, %24 : vector<32x128xf32>
    %30 = arith.mulf %22, %25 : vector<32x128xf32>
    %31 = arith.addf %29, %30 : vector<32x128xf32>
    %32 = vector.extract_strided_slice %28 {offsets = [0, 0], sizes = [32, 32], strides = [1, 1]} : vector<32x128xf32> to vector<32x32xf32>
    %33 = vector.shape_cast %32 : vector<32x32xf32> to vector<2x16x32xf32>
    %34 = vector.extract_strided_slice %28 {offsets = [0, 32], sizes = [32, 32], strides = [1, 1]} : vector<32x128xf32> to vector<32x32xf32>
    %35 = vector.shape_cast %34 : vector<32x32xf32> to vector<2x16x32xf32>
    %36 = vector.extract_strided_slice %28 {offsets = [0, 64], sizes = [32, 32], strides = [1, 1]} : vector<32x128xf32> to vector<32x32xf32>
    %37 = vector.shape_cast %36 : vector<32x32xf32> to vector<2x16x32xf32>
    %38 = vector.extract_strided_slice %28 {offsets = [0, 96], sizes = [32, 32], strides = [1, 1]} : vector<32x128xf32> to vector<32x32xf32>
    %39 = vector.shape_cast %38 : vector<32x32xf32> to vector<2x16x32xf32>
    %40 = tpu.concatenate %33, %35, %37, %39 in 0 : vector<2x16x32xf32>, vector<2x16x32xf32>, vector<2x16x32xf32>, vector<2x16x32xf32> -> vector<8x16x32xf32>
    %41 = vector.extract_strided_slice %31 {offsets = [0, 0], sizes = [32, 32], strides = [1, 1]} : vector<32x128xf32> to vector<32x32xf32>
    %42 = vector.shape_cast %41 : vector<32x32xf32> to vector<2x16x32xf32>
    %43 = vector.extract_strided_slice %31 {offsets = [0, 32], sizes = [32, 32], strides = [1, 1]} : vector<32x128xf32> to vector<32x32xf32>
    %44 = vector.shape_cast %43 : vector<32x32xf32> to vector<2x16x32xf32>
    %45 = vector.extract_strided_slice %31 {offsets = [0, 64], sizes = [32, 32], strides = [1, 1]} : vector<32x128xf32> to vector<32x32xf32>
    %46 = vector.shape_cast %45 : vector<32x32xf32> to vector<2x16x32xf32>
    %47 = vector.extract_strided_slice %31 {offsets = [0, 96], sizes = [32, 32], strides = [1, 1]} : vector<32x128xf32> to vector<32x32xf32>
    %48 = vector.shape_cast %47 : vector<32x32xf32> to vector<2x16x32xf32>
    %49 = tpu.concatenate %42, %44, %46, %48 in 0 : vector<2x16x32xf32>, vector<2x16x32xf32>, vector<2x16x32xf32>, vector<2x16x32xf32> -> vector<8x16x32xf32>
    %50 = vector.extract_strided_slice %23 {offsets = [0, 0], sizes = [32, 32], strides = [1, 1]} : vector<32x128xf32> to vector<32x32xf32>
    %51 = vector.shape_cast %50 : vector<32x32xf32> to vector<2x16x32xf32>
    %52 = vector.extract_strided_slice %23 {offsets = [0, 32], sizes = [32, 32], strides = [1, 1]} : vector<32x128xf32> to vector<32x32xf32>
    %53 = vector.shape_cast %52 : vector<32x32xf32> to vector<2x16x32xf32>
    %54 = vector.extract_strided_slice %23 {offsets = [0, 64], sizes = [32, 32], strides = [1, 1]} : vector<32x128xf32> to vector<32x32xf32>
    %55 = vector.shape_cast %54 : vector<32x32xf32> to vector<2x16x32xf32>
    %56 = vector.extract_strided_slice %23 {offsets = [0, 96], sizes = [32, 32], strides = [1, 1]} : vector<32x128xf32> to vector<32x32xf32>
    %57 = vector.shape_cast %56 : vector<32x32xf32> to vector<2x16x32xf32>
    %58 = tpu.concatenate %51, %53, %55, %57 in 0 : vector<2x16x32xf32>, vector<2x16x32xf32>, vector<2x16x32xf32>, vector<2x16x32xf32> -> vector<8x16x32xf32>
    %59 = tpu.iota {dimensions = array<i32: 0>} : vector<16x16xi32>
    %60 = tpu.iota {dimensions = array<i32: 1>} : vector<16x16xi32>
    %61 = arith.cmpi sge, %59, %60 : vector<16x16xi32>
    "tpu.trace_start"() <{level = 10 : i32, message = "gth,gsh->gts"}> : () -> ()
    %cst_13 = arith.constant dense<0.000000e+00> : vector<8x16x16xf32>
    %62 = tpu.matmul %40, %49, %cst_13 {dimension_numbers = #tpu.dot_dimension_numbers<[2], [2], [1], [1], [0, 0, 0, 1, 1, 1], [0], [0]>} : vector<8x16x32xf32>, vector<8x16x32xf32>, vector<8x16x16xf32> -> vector<8x16x16xf32>
    "tpu.trace_stop"() : () -> ()
    %cst_14 = arith.constant 0.176776692 : f32
    %63 = vector.broadcast %cst_14 : f32 to vector<8x16x16xf32>
    %64 = arith.mulf %62, %63 : vector<8x16x16xf32>
    %cst_15 = arith.constant 0xFF800000 : f32
    %65 = vector.shape_cast %61 : vector<16x16xi1> to vector<1x16x16xi1>
    %66 = vector.broadcast %65 : vector<1x16x16xi1> to vector<8x16x16xi1>
    %67 = vector.broadcast %cst_15 : f32 to vector<8x16x16xf32>
    %68 = arith.select %66, %64, %67 : vector<8x16x16xi1>, vector<8x16x16xf32>
    %cst_16 = arith.constant dense<0xFF800000> : vector<8x16xf32>
    %69 = vector.multi_reduction <maximumf>, %68, %cst_16 [2] : vector<8x16x16xf32> to vector<8x16xf32>
    %70 = vector.shape_cast %69 : vector<8x16xf32> to vector<8x16x1xf32>
    %71 = vector.broadcast %70 : vector<8x16x1xf32> to vector<8x16x16xf32>
    %72 = arith.subf %68, %71 : vector<8x16x16xf32>
    %73 = math.exp %72 : vector<8x16x16xf32>
    %cst_17 = arith.constant dense<0.000000e+00> : vector<8x16xf32>
    %74 = vector.multi_reduction <add>, %73, %cst_17 [2] : vector<8x16x16xf32> to vector<8x16xf32>
    %75 = vector.shape_cast %74 : vector<8x16xf32> to vector<8x16x1xf32>
    %76 = tpu.reciprocal %75 {approx = true} : vector<8x16x1xf32> -> vector<8x16x1xf32>
    %77 = vector.broadcast %76 : vector<8x16x1xf32> to vector<8x16x16xf32>
    %78 = arith.mulf %73, %77 : vector<8x16x16xf32>
    "tpu.trace_start"() <{level = 10 : i32, message = "gts,gsh->gth"}> : () -> ()
    %cst_18 = arith.constant dense<0.000000e+00> : vector<8x16x32xf32>
    %79 = tpu.matmul %78, %58, %cst_18 {dimension_numbers = #tpu.dot_dimension_numbers<[2], [1], [1], [2], [0, 0, 0, 1, 1, 2], [0], [0]>} : vector<8x16x16xf32>, vector<8x16x32xf32>, vector<8x16x32xf32> -> vector<8x16x32xf32>
    "tpu.trace_stop"() : () -> ()
    %80 = vector.extract_strided_slice %79 {offsets = [0, 0, 0], sizes = [2, 16, 32], strides = [1, 1, 1]} : vector<8x16x32xf32> to vector<2x16x32xf32>
    %81 = vector.extract_strided_slice %79 {offsets = [2, 0, 0], sizes = [2, 16, 32], strides = [1, 1, 1]} : vector<8x16x32xf32> to vector<2x16x32xf32>
    %82 = vector.extract_strided_slice %79 {offsets = [4, 0, 0], sizes = [2, 16, 32], strides = [1, 1, 1]} : vector<8x16x32xf32> to vector<2x16x32xf32>
    %83 = vector.extract_strided_slice %79 {offsets = [6, 0, 0], sizes = [2, 16, 32], strides = [1, 1, 1]} : vector<8x16x32xf32> to vector<2x16x32xf32>
    %84 = tpu.concatenate %80, %81, %82, %83 in 2 : vector<2x16x32xf32>, vector<2x16x32xf32>, vector<2x16x32xf32>, vector<2x16x32xf32> -> vector<2x16x128xf32>
    %85 = arith.addf %84, %0 : vector<2x16x128xf32>
    %86 = vector.shape_cast %85 : vector<2x16x128xf32> to vector<32x128xf32>
    %c0_19 = arith.constant 0 : index
    %c0_20 = arith.constant 0 : index
    %87 = vector.load %arg6[%c0_19, %c0_20] : memref<1x128xf32, #tpu.memory_space<vmem>>, vector<1x128xf32>
    %88 = vector.shape_cast %87 : vector<1x128xf32> to vector<128xf32>
    %89 = arith.mulf %86, %86 : vector<32x128xf32>
    %cst_21 = arith.constant dense<0.000000e+00> : vector<32xf32>
    %90 = vector.multi_reduction <add>, %89, %cst_21 [1] : vector<32x128xf32> to vector<32xf32>
    %91 = vector.shape_cast %90 : vector<32xf32> to vector<32x1xf32>
    %cst_22 = arith.constant 1.280000e+02 : f32
    %92 = vector.broadcast %cst_22 : f32 to vector<32x1xf32>
    %93 = arith.divf %91, %92 : vector<32x1xf32>
    %94 = math.sqrt %93 : vector<32x1xf32>
    %cst_23 = arith.constant 9.99999993E-9 : f32
    %95 = vector.broadcast %cst_23 : f32 to vector<32x1xf32>
    %96 = arith.addf %94, %95 : vector<32x1xf32>
    %97 = vector.broadcast %96 : vector<32x1xf32> to vector<32x128xf32>
    %98 = arith.divf %86, %97 : vector<32x128xf32>
    %99 = vector.shape_cast %88 : vector<128xf32> to vector<1x128xf32>
    %100 = vector.broadcast %99 : vector<1x128xf32> to vector<32x128xf32>
    %101 = arith.mulf %98, %100 : vector<32x128xf32>
    %c0_24 = arith.constant 0 : index
    %c0_25 = arith.constant 0 : index
    %102 = vector.load %arg7[%c0_24, %c0_25] : memref<128x512xf32, #tpu.memory_space<vmem>>, vector<128x512xf32>
    %cst_26 = arith.constant dense<0.000000e+00> : vector<32x512xf32>
    %103 = tpu.matmul %101, %102, %cst_26 {dimension_numbers = #tpu.dot_dimension_numbers<[1], [0], [0], [1], [0, 0, 1, 1], [], []>} : vector<32x128xf32>, vector<128x512xf32>, vector<32x512xf32> -> vector<32x512xf32>
    %cst_27 = arith.constant 0.000000e+00 : f32
    %104 = vector.broadcast %cst_27 : f32 to vector<32x512xf32>
    %105 = arith.maximumf %103, %104 : vector<32x512xf32>
    %106 = arith.mulf %105, %105 : vector<32x512xf32>
    %c0_28 = arith.constant 0 : index
    %c0_29 = arith.constant 0 : index
    %107 = vector.load %arg8[%c0_28, %c0_29] : memref<512x128xf32, #tpu.memory_space<vmem>>, vector<512x128xf32>
    %cst_30 = arith.constant dense<0.000000e+00> : vector<32x128xf32>
    %108 = tpu.matmul %106, %107, %cst_30 {dimension_numbers = #tpu.dot_dimension_numbers<[1], [0], [0], [1], [0, 0, 1, 1], [], []>} : vector<32x512xf32>, vector<512x128xf32>, vector<32x128xf32> -> vector<32x128xf32>
    %109 = arith.addf %108, %86 : vector<32x128xf32>
    %110 = vector.shape_cast %109 : vector<32x128xf32> to vector<2x16x128xf32>
    %c0_31 = arith.constant 0 : index
    %c0_32 = arith.constant 0 : index
    %c0_33 = arith.constant 0 : index
    %111 = vector.load %arg9[%c0_31, %c0_32, %c0_33] : memref<2x16x128xf32, #tpu.memory_space<vmem>>, vector<2x16x128xf32>
    tpu.vector_store %arg9[%c0_31, %c0_32, %c0_33], %110 {strides = array<i32>} : memref<2x16x128xf32, #tpu.memory_space<vmem>>, vector<2x16x128xf32>,
    return
  }
  func.func @transform_0(%arg0: i32) -> (i32, i32, i32) {
    %c0_i32 = arith.constant 0 : i32
    %c0_i32_0 = arith.constant 0 : i32
    %c0_i32_1 = arith.constant 0 : i32
    return %arg0, %c0_i32, %c0_i32_0 : i32, i32, i32
  }
  func.func @transform_1(%arg0: i32) -> (i32, i32) {
    %c0_i32 = arith.constant 0 : i32
    %c0_i32_0 = arith.constant 0 : i32
    %c0_i32_1 = arith.constant 0 : i32
    return %c0_i32, %c0_i32_0 : i32, i32
  }
  func.func @transform_2(%arg0: i32) -> (i32, i32) {
    %c0_i32 = arith.constant 0 : i32
    %c0_i32_0 = arith.constant 0 : i32
    %c0_i32_1 = arith.constant 0 : i32
    return %c0_i32, %c0_i32_0 : i32, i32
  }
  func.func @transform_3(%arg0: i32) -> (i32, i32) {
    %c0_i32 = arith.constant 0 : i32
    %c0_i32_0 = arith.constant 0 : i32
    %c0_i32_1 = arith.constant 0 : i32
    return %c0_i32, %c0_i32_0 : i32, i32
  }
  func.func @transform_4(%arg0: i32) -> (i32, i32) {
    %c0_i32 = arith.constant 0 : i32
    %c0_i32_0 = arith.constant 0 : i32
    %c0_i32_1 = arith.constant 0 : i32
    return %c0_i32, %c0_i32_0 : i32, i32
  }
  func.func @transform_5(%arg0: i32) -> (i32, i32) {
    %c0_i32 = arith.constant 0 : i32
    %c0_i32_0 = arith.constant 0 : i32
    %c0_i32_1 = arith.constant 0 : i32
    return %c0_i32, %c0_i32_0 : i32, i32
  }
  func.func @transform_6(%arg0: i32) -> (i32, i32) {
    %c0_i32 = arith.constant 0 : i32
    %c0_i32_0 = arith.constant 0 : i32
    %c0_i32_1 = arith.constant 0 : i32
    return %c0_i32, %c0_i32_0 : i32, i32
  }
  func.func @transform_7(%arg0: i32) -> (i32, i32) {
    %c0_i32 = arith.constant 0 : i32
    %c0_i32_0 = arith.constant 0 : i32
    %c0_i32_1 = arith.constant 0 : i32
    return %c0_i32, %c0_i32_0 : i32, i32
  }
  func.func @transform_8(%arg0: i32) -> (i32, i32, i32) {
    %c0_i32 = arith.constant 0 : i32
    %c0_i32_0 = arith.constant 0 : i32
    %c0_i32_1 = arith.constant 0 : i32
    return %arg0, %c0_i32, %c0_i32_0 : i32, i32, i32
  }
}

</mosaic_0001>

<bundles_post_ra>
// kernel: tpu_custom_call.1
= control target key start
LH: loop header
LB: loop body
LE: loop exit
PB: predicated region body
PF: predicated region fallthrough
CT: control target
= control target key end

     0   :  { %13 = vsyncpa [#allocation3], 0  ;;  %s2975_s0 = inlined_call_operand.hbm [shape: f32[2,16,128], index: 0, kind: input, shape index: {}]   ;;  %s2976_s1 = inlined_call_operand.hbm [shape: f32[1,128], index: 1, kind: input, shape index: {}]   ;;  %s2977_s2 = inlined_call_operand.hbm [shape: f32[128,640], index: 2, kind: input, shape index: {}]   ;;  %s2978_s3 = inlined_call_operand.hbm [shape: f32[32,128], index: 3, kind: input, shape index: {}]   ;;  %s2979_s4 = inlined_call_operand.hbm [shape: f32[32,128], index: 4, kind: input, shape index: {}]   ;;  %s2980_s5 = inlined_call_operand.vmem [shape: f32[1,128], index: 5, kind: input, shape index: {}]   ;;  %s2981_s6 = inlined_call_operand.hbm [shape: f32[128,512], index: 6, kind: input, shape index: {}]   ;;  %s2982_s7 = inlined_call_operand.hbm [shape: f32[512,128], index: 7, kind: input, shape index: {}]   ;;  %s2983_s8 = inlined_call_operand.hbm [shape: f32[2,16,128], index: 8, kind: output, shape index: {}]  }
   0x1   :  { %14 = vsyncpa [#allocation6], 0 }
   0x2   :  { %15 = vsyncpa [#allocation9], 0 }
   0x3   :  { %16 = vsyncpa [#allocation12], 0  ;;  %s36_s29 = sshll.u32 %s2976_s1, 4  ;;  %s37_s29 = int_to_ptr.hbm [resolvable:$true] %s36_s29 }
   0x4   :  { %17 = vsyncpa [#allocation4], 0  ;;  %s2377_s30 = smov [#allocation5]   ;;  %s59_s12 = sshll.u32 %s2978_s3, 4  ;;  %s60_s12 = int_to_ptr.hbm [resolvable:$true] %s59_s12 }
   0x5   :  { %s38_s9 = sshll.u32 %s2377_s30, 4  ;;  %s2378_s13 = smov [#allocation8]   ;;  %s39_s9 = int_to_ptr.vmem [resolvable:$true] %s38_s9 }
   0x6   :  { %41 = dma.hbm_to_vmem [thread:$0]  %s37_s29, 16, %s39_s9, [#allocation6]  }
   0x7   :  { %s61_s14 = sshll.u32 %s2378_s13, 4  ;;  %s87_s17 = sshll.u32 %s2981_s6, 4  ;;  %s62_s14 = int_to_ptr.vmem [resolvable:$true] %s61_s14  ;;  %s88_s17 = int_to_ptr.hbm [resolvable:$true] %s87_s17 }
   0x8   :  { %s2379_s1 = smov 128   ;;  %s2380_s18 = smov 8  }
   0x9   :  { %67 = dma.hbm_to_vmem [thread:$0]  %s60_s12, 512, %s62_s14, [#allocation9], %s2379_s1, %s2379_s1, %s2380_s18  }
   0xa   :  { %s2381_s19 = smov [#allocation11]   ;;  %s22_s22 = sshll.u32 %s2975_s0, 4  ;;  %s23_s22 = int_to_ptr.hbm [resolvable:$true] %s22_s22 }
   0xb   :  { %s89_s20 = sshll.u32 %s2381_s19, 4  ;;  %s2382_s23 = smov 512   ;;  %s90_s20 = int_to_ptr.vmem [resolvable:$true] %s89_s20 }
   0xc   :  { %s2383_s24 = smov 32   ;;  %s2384_s6 = smov [#allocation2]  }
   0xd   :  { %95 = dma.hbm_to_vmem [thread:$0]  %s88_s17, 8192, %s90_s20, [#allocation12], %s2382_s23, %s2382_s23, %s2383_s24  }
   0xe   :  { %s24_s25 = sshll.u32 %s2384_s6, 4  ;;  %s46_s28 = sshll.u32 %s2977_s2, 4  ;;  %s25_s25 = int_to_ptr.vmem [resolvable:$true] %s24_s25  ;;  %s47_s28 = int_to_ptr.hbm [resolvable:$true] %s46_s28 }
   0xf   :  { %30 = dma.hbm_to_vmem [thread:$0]  %s23_s22, 512, %s25_s25, [#allocation3], %s2379_s1, %s2379_s1, %s2380_s18  }
  0x10   :  { %s2385_s29 = smov [#allocation7]   ;;  %s72_s10 = sshll.u32 %s2979_s4, 4  ;;  %s73_s10 = int_to_ptr.hbm [resolvable:$true] %s72_s10 }
  0x11   :  { %s48_s30 = sshll.u32 %s2385_s29, 4  ;;  %s2386_s11 = smov 640   ;;  %s49_s30 = int_to_ptr.vmem [resolvable:$true] %s48_s30 }
  0x12   :  { %s2387_s12 = smov 40   ;;  %s2388_s13 = smov [#allocation10]  }
  0x13   :  { %54 = dma.hbm_to_vmem [thread:$0]  %s47_s28, 10240, %s49_s30, [#allocation6], %s2386_s11, %s2386_s11, %s2387_s12  }
  0x14   :  { %s74_s14 = sshll.u32 %s2388_s13, 4  ;;  %s100_s16 = sshll.u32 %s2982_s7, 4  ;;  %s75_s14 = int_to_ptr.vmem [resolvable:$true] %s74_s14  ;;  %s101_s16 = int_to_ptr.hbm [resolvable:$true] %s100_s16 }
  0x15   :  { %80 = dma.hbm_to_vmem [thread:$0]  %s73_s10, 512, %s75_s14, [#allocation9], %s2379_s1, %s2379_s1, %s2380_s18  }
  0x16   :  { %s2389_s17 = smov [#allocation13]  }
  0x17   :  { %s102_s19 = sshll.u32 %s2389_s17, 4  ;;  %s103_s19 = int_to_ptr.vmem [resolvable:$true] %s102_s19 }
  0x18   :  { %108 = dma.hbm_to_vmem [thread:$0]  %s101_s16, 8192, %s103_s19, [#allocation12], %s2379_s1, %s2379_s1, %s2380_s18  }
  0x19   :  { %2367 = dma.done.wait [#allocation3], 512  }
  0x1a   :  { %2368 = vsyncadd [#allocation3], 4294966784 }
  0x1b   :  { %2369 = dma.done.wait [#allocation6], 10256  }
  0x1c   :  { %2370 = vsyncadd [#allocation6], 4294957040 }
  0x1d   :  { %2371 = dma.done.wait [#allocation9], 1024  }
  0x1e   :  { %2372 = vsyncadd [#allocation9], 4294966272 }
  0x1f   :  { %2373 = dma.done.wait [#allocation12], 16384  }
  0x20   :  { %2374 = vsyncadd [#allocation12], 4294950912  ;;  %v2473_v0 = vld [vmem:[#allocation2] sm:$0xff]  ;;  %v2475_v1 = vld [vmem:[#allocation2 + $0x10] sm:$0xff]  ;;  %v2390_v8 = vmov 128.0   ;;  %s2391_s4 = smov 64  }
  0x21   :  { %v142_v2 = vmul.f32 %v2473_v0, %v2473_v0  ;;  %v144_v3 = vmul.f32 %v2475_v1, %v2475_v1  ;;  %v2481_v4 = vld [vmem:[#allocation2 + $0x8] sm:$0xff]  ;;  %v2483_v5 = vld [vmem:[#allocation2 + $0x18] sm:$0xff]  ;;  %2073 = vrcp.f32 %v2390_v8  ;;  %s2392_s7 = smov 96  }
  0x22   :  { %v143_v6 = vmul.f32 %v2481_v4, %v2481_v4  ;;  %v145_v7 = vmul.f32 %v2483_v5, %v2483_v5  ;;  %v359_v11 = vld [vmem:[#allocation7 + $0x258] sm:$0xff]  ;;  %v360_v12 = vld [vmem:[#allocation7 + $0x260] sm:$0xff]  ;;  %v361_v13 = vld [vmem:[#allocation7 + $0x268] sm:$0xff] }
  0x23   :  { %146 = vadd.xlane.f32.xlu0 %v142_v2  ;;  %150 = vadd.xlane.f32.xlu1 %v144_v3  ;;  %v362_v14 = vld [vmem:[#allocation7 + $0x270] sm:$0xff]  ;;  %v355_v16 = vld [vmem:[#allocation7 + $0x238] sm:$0xff]  ;;  %v356_v17 = vld [vmem:[#allocation7 + $0x240] sm:$0xff] }
  0x24   :  { %364 = vmatpush.msra.mxu0 %v359_v11  ;;  %393 = vmatpush.msra.mxu1 %v360_v12  ;;  %v354_v15 = vld [vmem:[#allocation7 + $0x230] sm:$0xff]  ;;  %v357_v19 = vld [vmem:[#allocation7 + $0x248] sm:$0xff]  ;;  %v351_v22 = vld [vmem:[#allocation7 + $0x218] sm:$0xff] }
  0x25   :  { %422 = vmatpush.msra.mxu2 %v361_v13  ;;  %451 = vmatpush.msra.mxu3 %v362_v14  ;;  %v349_v20 = vld [vmem:[#allocation7 + $0x208] sm:$0xff]  ;;  %v350_v21 = vld [vmem:[#allocation7 + $0x210] sm:$0xff]  ;;  %v352_v23 = vld [vmem:[#allocation7 + $0x220] sm:$0xff] }
  0x26   :  { %365 = vmatpush.msra.mxu0 %v354_v15  ;;  %394 = vmatpush.msra.mxu1 %v355_v16  ;;  %v344_v24 = vld [vmem:[#allocation7 + $0x1e0] sm:$0xff]  ;;  %v345_v25 = vld [vmem:[#allocation7 + $0x1e8] sm:$0xff]  ;;  %v346_v26 = vld [vmem:[#allocation7 + $0x1f0] sm:$0xff] }
  0x27   :  { %v2489_v9 = vpop.eup %2073  ;;  %423 = vmatpush.msra.mxu2 %v356_v17  ;;  %452 = vmatpush.msra.mxu3 %v357_v19  ;;  %v347_v28 = vld [vmem:[#allocation7 + $0x1f8] sm:$0xff]  ;;  %v340_v30 = vld [vmem:[#allocation7 + $0x1c0] sm:$0xff]  ;;  %v341_v31 = vld [vmem:[#allocation7 + $0x1c8] sm:$0xff] }
  0x28   :  { %v155_v10 = vmul.f32 128.0, %v2489_v9  ;;  %366 = vmatpush.msra.mxu0 %v349_v20  ;;  %395 = vmatpush.msra.mxu1 %v350_v21  ;;  %v339_v29 = vld [vmem:[#allocation7 + $0x1b8] sm:$0xff]  ;;  %v342_v32 = vld [vmem:[#allocation7 + $0x1d0] sm:$0xff]  ;;  %v336_v35 = vld [vmem:[#allocation7 + $0x1a0] sm:$0xff]  ;;  %vm159_vm0 = vweird.f32 %v2489_v9 }
  0x29   :  { %424 = vmatpush.msra.mxu2 %v351_v22  ;;  %453 = vmatpush.msra.mxu3 %v352_v23  ;;  %v334_v33 = vld [vmem:[#allocation7 + $0x190] sm:$0xff]  ;;  %v335_v34 = vld [vmem:[#allocation7 + $0x198] sm:$0xff]  ;;  %v337_v37 = vld [vmem:[#allocation7 + $0x1a8] sm:$0xff] }
  0x2a   :  { %v156_v18 = vsub.f32 1.0, %v155_v10  ;;  %367 = vmatpush.msra.mxu0 %v344_v24  ;;  %396 = vmatpush.msra.mxu1 %v345_v25  ;;  %v329_v38 = vld [vmem:[#allocation7 + $0x168] sm:$0xff]  ;;  %v330_v39 = vld [vmem:[#allocation7 + $0x170] sm:$0xff]  ;;  %v331_v40 = vld [vmem:[#allocation7 + $0x178] sm:$0xff] }
  0x2b   :  { %148 = vadd.xlane.f32.xlu0 %v143_v6  ;;  %152 = vadd.xlane.f32.xlu1 %v145_v7  ;;  %v332_v41 = vld [vmem:[#allocation7 + $0x180] sm:$0xff]  ;;  %v325_v43 = vld [vmem:[#allocation7 + $0x148] sm:$0xff]  ;;  %v326_v44 = vld [vmem:[#allocation7 + $0x150] sm:$0xff] }
  0x2c   :  { %v157_v27 = vmul.f32 %v2489_v9, %v156_v18  ;;  %425 = vmatpush.msra.mxu2 %v346_v26  ;;  %454 = vmatpush.msra.mxu3 %v347_v28  ;;  %v324_v42 = vld [vmem:[#allocation7 + $0x140] sm:$0xff]  ;;  %v327_v46 = vld [vmem:[#allocation7 + $0x158] sm:$0xff]  ;;  %v321_v49 = vld [vmem:[#allocation7 + $0x128] sm:$0xff] }
  0x2d   :  { %368 = vmatpush.msra.mxu0 %v339_v29  ;;  %397 = vmatpush.msra.mxu1 %v340_v30  ;;  %v319_v47 = vld [vmem:[#allocation7 + $0x118] sm:$0xff]  ;;  %v320_v48 = vld [vmem:[#allocation7 + $0x120] sm:$0xff]  ;;  %v322_v52 = vld [vmem:[#allocation7 + $0x130] sm:$0xff] }
  0x2e   :  { %426 = vmatpush.msra.mxu2 %v341_v31  ;;  %455 = vmatpush.msra.mxu3 %v342_v32  ;;  %v158_v36 = vadd.f32 %v2489_v9, %v157_v27  ;;  %v314_v55 = vld [vmem:[#allocation7 + $0xf0] sm:$0xff]  ;;  %v315_v56 = vld [vmem:[#allocation7 + $0xf8] sm:$0xff]  ;;  %v316_v57 = vld [vmem:[#allocation7 + $0x100] sm:$0xff] }
  0x2f   :  { %369 = vmatpush.msra.mxu0 %v334_v33  ;;  %398 = vmatpush.msra.mxu1 %v335_v34  ;;  %v317_v58 = vld [vmem:[#allocation7 + $0x108] sm:$0xff]  ;;  %v310_v60 = vld [vmem:[#allocation7 + $0xd0] sm:$0xff]  ;;  %v311_v61 = vld [vmem:[#allocation7 + $0xd8] sm:$0xff] }
  0x30   :  { %427 = vmatpush.msra.mxu2 %v336_v35  ;;  %456 = vmatpush.msra.mxu3 %v337_v37  ;;  %v2496_v45 = vsel %vm159_vm0, %v2489_v9, %v158_v36  ;;  %v309_v59 = vld [vmem:[#allocation7 + $0xc8] sm:$0xff]  ;;  %v312_v62 = vld [vmem:[#allocation7 + $0xe0] sm:$0xff]  ;;  %v306_v3 = vld [vmem:[#allocation7 + $0xb0] sm:$0xff] }
  0x31   :  { %370 = vmatpush.msra.mxu0 %v329_v38  ;;  %399 = vmatpush.msra.mxu1 %v330_v39  ;;  %v304_v63 = vld [vmem:[#allocation7 + $0xa0] sm:$0xff]  ;;  %v305_v2 = vld [vmem:[#allocation7 + $0xa8] sm:$0xff]  ;;  %v307_v6 = vld [vmem:[#allocation7 + $0xb8] sm:$0xff] }
  0x32   :  { %428 = vmatpush.msra.mxu2 %v331_v40  ;;  %457 = vmatpush.msra.mxu3 %v332_v41  ;;  %v299_v7 = vld [vmem:[#allocation7 + $0x78] sm:$0xff]  ;;  %v300_v8 = vld [vmem:[#allocation7 + $0x80] sm:$0xff]  ;;  %v301_v9 = vld [vmem:[#allocation7 + $0x88] sm:$0xff] }
  0x33   :  { %371 = vmatpush.msra.mxu0 %v324_v42  ;;  %400 = vmatpush.msra.mxu1 %v325_v43  ;;  %v302_v10 = vld [vmem:[#allocation7 + $0x90] sm:$0xff]  ;;  %v295_v12 = vld [vmem:[#allocation7 + $0x58] sm:$0xff]  ;;  %v296_v15 = vld [vmem:[#allocation7 + $0x60] sm:$0xff] }
  0x34   :  { %429 = vmatpush.msra.mxu2 %v326_v44  ;;  %458 = vmatpush.msra.mxu3 %v327_v46  ;;  %v294_v11 = vld [vmem:[#allocation7 + $0x50] sm:$0xff]  ;;  %v297_v16 = vld [vmem:[#allocation7 + $0x68] sm:$0xff]  ;;  %v291_v24 = vld [vmem:[#allocation7 + $0x38] sm:$0xff] }
  0x35   :  { %372 = vmatpush.msra.mxu0 %v319_v47  ;;  %401 = vmatpush.msra.mxu1 %v320_v48  ;;  %v289_v20 = vld [vmem:[#allocation7 + $0x28] sm:$0xff]  ;;  %v290_v21 = vld [vmem:[#allocation7 + $0x30] sm:$0xff]  ;;  %v292_v25 = vld [vmem:[#allocation7 + $0x40] sm:$0xff] }
  0x36   :  { %430 = vmatpush.msra.mxu2 %v321_v49  ;;  %459 = vmatpush.msra.mxu3 %v322_v52  ;;  %v284_v26 = vld [vmem:[#allocation7] sm:$0xff]  ;;  %v285_v27 = vld [vmem:[#allocation7 + $0x8] sm:$0xff]  ;;  %v286_v30 = vld [vmem:[#allocation7 + $0x10] sm:$0xff] }
  0x37   :  { %373 = vmatpush.msra.mxu0 %v314_v55  ;;  %402 = vmatpush.msra.mxu1 %v315_v56  ;;  %v287_v31 = vld [vmem:[#allocation7 + $0x18] sm:$0xff]  ;;  %v358_v37 = vld [vmem:[#allocation7 + $0x250] sm:$0xff]  ;;  %v353_v43 = vld [vmem:[#allocation7 + $0x228] sm:$0xff] }
  0x38   :  { %431 = vmatpush.msra.mxu2 %v316_v57  ;;  %460 = vmatpush.msra.mxu3 %v317_v58  ;;  %v363_v36 = vld [vmem:[#allocation7 + $0x278] sm:$0xff]  ;;  %v348_v49 = vld [vmem:[#allocation7 + $0x200] sm:$0xff] }
  0x39   :  { %374 = vmatpush.msra.mxu0 %v309_v59  ;;  %403 = vmatpush.msra.mxu1 %v310_v60 }
  0x3a   :  { %432 = vmatpush.msra.mxu2 %v311_v61  ;;  %461 = vmatpush.msra.mxu3 %v312_v62 }
  0x3b   :  { %375 = vmatpush.msra.mxu0 %v304_v63  ;;  %404 = vmatpush.msra.mxu1 %v305_v2  ;;  %v343_v63 = vld [vmem:[#allocation7 + $0x1d8] sm:$0xff]  ;;  %v338_v2 = vld [vmem:[#allocation7 + $0x1b0] sm:$0xff] }
  0x3c   :  { %433 = vmatpush.msra.mxu2 %v306_v3  ;;  %462 = vmatpush.msra.mxu3 %v307_v6 }
  0x3d   :  { %376 = vmatpush.msra.mxu0 %v299_v7  ;;  %405 = vmatpush.msra.mxu1 %v300_v8  ;;  %v333_v8 = vld [vmem:[#allocation7 + $0x188] sm:$0xff] }
  0x3e   :  { %434 = vmatpush.msra.mxu2 %v301_v9  ;;  %463 = vmatpush.msra.mxu3 %v302_v10 }
  0x3f   :  { %377 = vmatpush.msra.mxu0 %v294_v11  ;;  %406 = vmatpush.msra.mxu1 %v295_v12  ;;  %v328_v11 = vld [vmem:[#allocation7 + $0x160] sm:$0xff] }
  0x40   :  { %435 = vmatpush.msra.mxu2 %v296_v15  ;;  %464 = vmatpush.msra.mxu3 %v297_v16 }
  0x41   :  { %378 = vmatpush.msra.mxu0 %v289_v20  ;;  %407 = vmatpush.msra.mxu1 %v290_v21 }
  0x42   :  { %436 = vmatpush.msra.mxu2 %v291_v24  ;;  %465 = vmatpush.msra.mxu3 %v292_v25 }
  0x43   :  { %379 = vmatpush.msra.mxu0 %v284_v26  ;;  %408 = vmatpush.msra.mxu1 %v285_v27 }
  0x44   :  { %437 = vmatpush.msra.mxu2 %v286_v30  ;;  %466 = vmatpush.msra.mxu3 %v287_v31 }
  0x45   :  { %480 = vmatpush.msrb.mxu0 %v363_v36 }
  0x46   :  { %2006 = vmatpush.msrb.mxu2 %v363_v36  ;;  %v303_v36 = vld [vmem:[#allocation7 + $0x98] sm:$0xff] }
  0x47   :  { %481 = vmatpush.msrb.mxu0 %v358_v37 }
  0x48   :  { %2007 = vmatpush.msrb.mxu2 %v358_v37  ;;  %v298_v37 = vld [vmem:[#allocation7 + $0x70] sm:$0xff] }
  0x49   :  { %482 = vmatpush.msrb.mxu0 %v353_v43 }
  0x4a   :  { %2008 = vmatpush.msrb.mxu2 %v353_v43 }
  0x4b   :  { %483 = vmatpush.msrb.mxu0 %v348_v49 }
  0x4c   :  { %2009 = vmatpush.msrb.mxu2 %v348_v49 }
  0x4d   :  { %484 = vmatpush.msrb.mxu0 %v343_v63 }
  0x4e   :  { %2010 = vmatpush.msrb.mxu2 %v343_v63 }
  0x4f   :  { %485 = vmatpush.msrb.mxu0 %v338_v2 }
  0x50   :  { %2011 = vmatpush.msrb.mxu2 %v338_v2 }
  0x51   :  { %486 = vmatpush.msrb.mxu0 %v333_v8 }
  0x52   :  { %2012 = vmatpush.msrb.mxu2 %v333_v8 }
  0x53   :  { %487 = vmatpush.msrb.mxu0 %v328_v11 }
  0x54   :  { %2013 = vmatpush.msrb.mxu2 %v328_v11 }
  0x96   :  { %v147_v50 = vpop.xlane.xlu0 %146  ;;  %v151_v51 = vpop.xlane.xlu1 %150 }
  0x97   :  { %v2499_v53 = vmul.f32 %v2496_v45, %v147_v50  ;;  %v2502_v54 = vmul.f32 %v2496_v45, %v151_v51 }
  0x99   :  { %2075 = vrsqrt.f32 %v2499_v53  ;;  %vm172_vm1 = vcmp.eq.f32.partialorder %v2499_v53, inf  ;;  %vm174_vm2 = vcmp.eq.f32.partialorder %v2499_v53, 0.0  ;;  %v175_v50 = vand.u32 2147483648, %v2499_v53 }
  0x9a   :  { %2077 = vrsqrt.f32 %v2502_v54  ;;  %vm196_vm3 = vcmp.eq.f32.partialorder %v2502_v54, inf  ;;  %v199_v51 = vand.u32 2147483648, %v2502_v54  ;;  %vm198_vm4 = vcmp.eq.f32.partialorder %v2502_v54, 0.0 }
  0x9e   :  { %v149_v13 = vpop.xlane.xlu0 %148  ;;  %v153_v14 = vpop.xlane.xlu1 %152 }
  0x9f   :  { %v2076_v17 = vpop.eup %2075  ;;  %v2507_v18 = vmul.f32 %v2496_v45, %v149_v13  ;;  %v2510_v19 = vmul.f32 %v2496_v45, %v153_v14 }
  0xa0   :  { %v2078_v22 = vpop.eup %2077  ;;  %v166_v23 = vmul.f32 %v2076_v17, %v2499_v53 }
  0xa1   :  { %2079 = vrsqrt.f32 %v2507_v18  ;;  %v190_v29 = vmul.f32 %v2078_v22, %v2502_v54  ;;  %vm208_vm5 = vcmp.eq.f32.partialorder %v2510_v19, inf  ;;  %vm184_vm6 = vcmp.eq.f32.partialorder %v2507_v18, inf }
  0xa2   :  { %v167_v28 = vmul.f32 %v2076_v17, %v166_v23  ;;  %2081 = vrsqrt.f32 %v2510_v19  ;;  %v187_v12 = vand.u32 2147483648, %v2507_v18  ;;  %vm210_vm7 = vcmp.eq.f32.partialorder %v2510_v19, 0.0  ;;  %v318_v23 = vld [vmem:[#allocation7 + $0x110] sm:$0xff] }
  0xa3   :  { %v191_v33 = vmul.f32 %v2078_v22, %v190_v29  ;;  %vm186_vm8 = vcmp.eq.f32.partialorder %v2507_v18, 0.0  ;;  %v308_v29 = vld [vmem:[#allocation7 + $0xc0] sm:$0xff] }
  0xa4   :  { %v168_v32 = vmul.f32 0.5, %v167_v28 }
  0xa5   :  { %v192_v35 = vmul.f32 0.5, %v191_v33 }
  0xa6   :  { %v169_v34 = vsub.f32 1.5, %v168_v32 }
  0xa7   :  { %v2080_v38 = vpop.eup %2079  ;;  %v193_v42 = vsub.f32 1.5, %v192_v35 }
  0xa8   :  { %v2082_v39 = vpop.eup %2081  ;;  %v170_v40 = vmul.f32 %v2076_v17, %v169_v34  ;;  %v178_v41 = vmul.f32 %v2080_v38, %v2507_v18 }
  0xa9   :  { %v202_v44 = vmul.f32 %v2082_v39, %v2510_v19  ;;  %v194_v48 = vmul.f32 %v2078_v22, %v193_v42  ;;  %v323_v22 = vld [vmem:[#allocation7 + $0x138] sm:$0xff] }
  0xaa   :  { %v171_v46 = vmul.f32 %v170_v40, %v2499_v53  ;;  %v179_v47 = vmul.f32 %v2080_v38, %v178_v41  ;;  %488 = vmatpush.msrb.mxu0 %v323_v22  ;;  %2014 = vmatpush.msrb.mxu2 %v323_v22  ;;  %v2560_v40 = vld [vmem:[#allocation5] ss:$0 sm:$0xff] }
  0xab   :  { %v203_v52 = vmul.f32 %v2082_v39, %v202_v44  ;;  %v195_v57 = vmul.f32 %v194_v48, %v2502_v54 }
  0xac   :  { %v173_v55 = vsel %vm172_vm1, %v2499_v53, %v171_v46  ;;  %v180_v56 = vmul.f32 0.5, %v179_v47  ;;  %489 = vmatpush.msrb.mxu0 %v318_v23  ;;  %2015 = vmatpush.msrb.mxu2 %v318_v23  ;;  %v293_v46 = vld [vmem:[#allocation7 + $0x48] sm:$0xff] }
  0xad   :  { %v176_v58 = vsel %vm174_vm2, %v175_v50, %v173_v55  ;;  %v204_v59 = vmul.f32 0.5, %v203_v52  ;;  %v197_v62 = vsel %vm196_vm3, %v2502_v54, %v195_v57  ;;  %v211_v54 = vand.u32 2147483648, %v2510_v19 }
  0xae   :  { %v2527_v60 = vadd.f32 1e-08, %v176_v58  ;;  %v181_v61 = vsub.f32 1.5, %v180_v56  ;;  %v200_v3 = vsel %vm198_vm4, %v199_v51, %v197_v62 }
  0xaf   :  { %v205_v6 = vsub.f32 1.5, %v204_v59  ;;  %v2531_v7 = vadd.f32 1e-08, %v200_v3  ;;  %v288_v59 = vld [vmem:[#allocation7 + $0x20] sm:$0xff] }
  0xb0   :  { %2083 = vrcp.f32 %v2527_v60  ;;  %v182_v53 = vmul.f32 %v2080_v38, %v181_v61  ;;  %v228_v28 = vand.u32 2147483648, %v2527_v60  ;;  %v226_v31 = vand.u32 2147483647, %v2527_v60 }
  0xb1   :  { %v206_v9 = vmul.f32 %v2082_v39, %v205_v6  ;;  %2085 = vrcp.f32 %v2531_v7  ;;  %vm222_vm10 = vweird.f32 %v2527_v60  ;;  %vm252_vm13 = vweird.f32 %v2531_v7 }
  0xb2   :  { %v183_v10 = vmul.f32 %v182_v53, %v2507_v18  ;;  %v229_v35 = vor.u32 1.1754944e-38, %v228_v28  ;;  %vm227_vm12 = vcmp.eq.f32.partialorder %v226_v31, 8.507059e+37  ;;  %v256_v49 = vand.u32 2147483647, %v2531_v7  ;;  %v510_v31 = vld [vmem:[#allocation8 + $0x8] sm:$0xff] }
  0xb3   :  { %v207_v13 = vmul.f32 %v206_v9, %v2510_v19  ;;  %v258_v52 = vand.u32 2147483648, %v2531_v7 }
  0xb4   :  { %v185_v14 = vsel %vm184_vm6, %v2507_v18, %v183_v10  ;;  %v313_v18 = vld [vmem:[#allocation7 + $0xe8] sm:$0xff]  ;;  %vm257_vm3 = vcmp.eq.f32.partialorder %v256_v49, 8.507059e+37  ;;  %v512_v49 = vld [vmem:[#allocation8 + $0x18] sm:$0xff] }
  0xb5   :  { %v188_v15 = vsel %vm186_vm8, %v187_v12, %v185_v14  ;;  %v209_v16 = vsel %vm208_vm5, %v2510_v19, %v207_v13  ;;  %490 = vmatpush.msrb.mxu0 %v313_v18  ;;  %2016 = vmatpush.msrb.mxu2 %v313_v18  ;;  %v259_v62 = vor.u32 1.1754944e-38, %v258_v52  ;;  %v516_v52 = vld [vmem:[#allocation10 + $0x18] sm:$0xff] }
  0xb6   :  { %v2084_v17 = vpop.eup %2083  ;;  %v2544_v20 = vadd.f32 1e-08, %v188_v15  ;;  %v212_v21 = vsel %vm210_vm7, %v211_v54, %v209_v16 }
  0xb7   :  { %v2546_v24 = vadd.f32 1e-08, %v212_v21  ;;  %v218_v25 = vmul.f32 %v2084_v17, %v2527_v60  ;;  %v2549_v26 = vpop.eup %2085  ;;  %vm223_vm9 = vweird.f32 %v2084_v17  ;;  %491 = vmatpush.msrb.mxu0 %v308_v29  ;;  %2017 = vmatpush.msrb.mxu2 %v308_v29  ;;  %v511_v29 = vld [vmem:[#allocation8 + $0x10] sm:$0xff] }
  0xb8   :  { %2087 = vrcp.f32 %v2544_v20  ;;  %v248_v27 = vmul.f32 %v2549_v26, %v2531_v7  ;;  %vm224_vm11 = vmor %vm222_vm10, %vm223_vm9  ;;  %vm253_vm14 = vweird.f32 %v2549_v26  ;;  %v241_v50 = vand.u32 2147483647, %v2544_v20 }
  0xb9   :  { %2089 = vrcp.f32 %v2546_v24  ;;  %v219_v19 = vsub.f32 1.0, %v218_v25  ;;  %492 = vmatpush.msrb.mxu0 %v303_v36  ;;  %2018 = vmatpush.msrb.mxu2 %v303_v36  ;;  %v243_v51 = vand.u32 2147483648, %v2544_v20  ;;  %vm2577_vm0 = vmor %vm252_vm13, %vm253_vm14  ;;  %vm237_vm1 = vweird.f32 %v2544_v20 }
  0xba   :  { %v249_v32 = vsub.f32 1.0, %v248_v27  ;;  %vm242_vm4 = vcmp.eq.f32.partialorder %v241_v50, 8.507059e+37  ;;  %vm267_vm5 = vweird.f32 %v2546_v24  ;;  %v273_v8 = vand.u32 2147483648, %v2546_v24 }
  0xbb   :  { %v220_v30 = vmul.f32 %v2084_v17, %v219_v19  ;;  %493 = vmatpush.msrb.mxu0 %v298_v37  ;;  %2019 = vmatpush.msrb.mxu2 %v298_v37  ;;  %v244_v61 = vor.u32 1.1754944e-38, %v243_v51  ;;  %v271_v54 = vand.u32 2147483647, %v2546_v24  ;;  %vm644_vm9 = vcmask 261120  }
  0xbc   :  { %v250_v42 = vmul.f32 %v2549_v26, %v249_v32  ;;  %v514_v32 = vld [vmem:[#allocation10 + $0x8] sm:$0xff]  ;;  %vm1390_vm13 = vcmask 523264   ;;  %vm1395_vm14 = vcmask 785408  }
  0xbd   :  { %v221_v33 = vadd.f32 %v2084_v17, %v220_v30  ;;  %494 = vmatpush.msrb.mxu0 %v293_v46  ;;  %2020 = vmatpush.msrb.mxu2 %v293_v46  ;;  %vm272_vm8 = vcmp.eq.f32.partialorder %v271_v54, 8.507059e+37  ;;  %v515_v30 = vld [vmem:[#allocation10 + $0x10] sm:$0xff] }
  0xbe   :  { %v2088_v34 = vpop.eup %2087  ;;  %v251_v57 = vadd.f32 %v2549_v26, %v250_v42 }
  0xbf   :  { %v2558_v38 = vpop.eup %2089  ;;  %v225_v39 = vsel %vm224_vm11, %v2084_v17, %v221_v33  ;;  %v233_v41 = vmul.f32 %v2088_v34, %v2544_v20  ;;  %vm238_vm15 = vweird.f32 %v2088_v34  ;;  %495 = vmatpush.msrb.mxu0 %v288_v59  ;;  %2021 = vmatpush.msrb.mxu2 %v288_v59  ;;  %v513_v17 = vld [vmem:[#allocation10] sm:$0xff]  ;;  %vm929_vm11 = vcmask 130048  }
  0xc0   :  { %v230_v43 = vsel %vm227_vm12, %v229_v35, %v225_v39  ;;  %v263_v44 = vmul.f32 %v2558_v38, %v2546_v24  ;;  %vm239_vm2 = vmor %vm237_vm1, %vm238_vm15  ;;  %v255_v2 = vsel %vm2577_vm0, %v2549_v26, %v251_v57  ;;  %vm268_vm6 = vweird.f32 %v2558_v38 }
  0xc1   :  { %v231_v47 = vmul.f32 %v230_v43, %v2473_v0  ;;  %v234_v48 = vsub.f32 1.0, %v233_v41  ;;  %v260_v7 = vsel %vm257_vm3, %v259_v62, %v255_v2  ;;  %vm269_vm7 = vmor %vm267_vm5, %vm268_vm6 }
  0xc2   :  { %v264_v0 = vsub.f32 1.0, %v263_v44  ;;  %v261_v11 = vmul.f32 %v260_v7, %v2475_v1  ;;  %v509_v1 = vld [vmem:[#allocation8] sm:$0xff] }
  0xc3   :  { %v280_v55 = vmul.f32 %v2560_v40, %v231_v47  ;;  %v235_v56 = vmul.f32 %v2088_v34, %v234_v48 }
  0xc4   :  { %v265_v3 = vmul.f32 %v2558_v38, %v264_v0  ;;  %v282_v13 = vmul.f32 %v2560_v40, %v261_v11 }
  0xc5   :  { %380 = vmatmul.f32.vlgmr.msra.gmra.mxu0 %v280_v55  ;;  %409 = vmatmul.f32.vlgmr.msra.gmra.mxu1 %v280_v55  ;;  %v236_v60 = vadd.f32 %v2088_v34, %v235_v56 }
  0xc6   :  { %438 = vmatmul.f32.vlgmr.msra.gmra.mxu2 %v280_v55  ;;  %467 = vmatmul.f32.vlgmr.msra.gmra.mxu3 %v280_v55  ;;  %v266_v10 = vadd.f32 %v2558_v38, %v265_v3 }
  0xc7   :  { %v240_v63 = vsel %vm239_vm2, %v2088_v34, %v236_v60 }
  0xc8   :  { %v245_v6 = vsel %vm242_vm4, %v244_v61, %v240_v63  ;;  %v270_v12 = vsel %vm269_vm7, %v2558_v38, %v266_v10 }
  0xc9   :  { %v246_v53 = vmul.f32 %v245_v6, %v2481_v4  ;;  %v274_v4 = vor.u32 1.1754944e-38, %v273_v8 }
  0xcb   :  { %v281_v9 = vmul.f32 %v2560_v40, %v246_v53  ;;  %v275_v14 = vsel %vm272_vm8, %v274_v4, %v270_v12 }
  0xcc   :  { %v276_v15 = vmul.f32 %v275_v14, %v2483_v5 }
  0xcd   :  { %383 = vmatmul.f32.gmra.mxu0 %v281_v9  ;;  %412 = vmatmul.f32.gmra.mxu1 %v281_v9 }
  0xce   :  { %441 = vmatmul.f32.gmra.mxu2 %v281_v9  ;;  %470 = vmatmul.f32.gmra.mxu3 %v281_v9  ;;  %v283_v16 = vmul.f32 %v2560_v40, %v276_v15 }
  0xd5   :  { %386 = vmatmul.f32.gmra.mxu0 %v282_v13  ;;  %415 = vmatmul.f32.gmra.mxu1 %v282_v13 }
  0xd6   :  { %444 = vmatmul.f32.gmra.mxu2 %v282_v13  ;;  %473 = vmatmul.f32.gmra.mxu3 %v282_v13 }
  0xdd   :  { %389 = vmatmul.f32.gmra.mxu0 %v283_v16  ;;  %418 = vmatmul.f32.gmra.mxu1 %v283_v16 }
  0xde   :  { %447 = vmatmul.f32.gmra.mxu2 %v283_v16  ;;  %476 = vmatmul.f32.gmra.mxu3 %v283_v16 }
  0xe5   :  { %496 = vmatmul.f32.vlgmr.msrb.gmra.mxu0 %v280_v55 }
  0xe6   :  { %505 = vmatmul.f32.vlgmr.msrb.gmra.mxu2 %v283_v16 }
  0xed   :  { %499 = vmatmul.f32.gmra.mxu0 %v281_v9 }
  0xf5   :  { %502 = vmatmul.f32.gmra.mxu0 %v282_v13 }
 0x142   :  { %v381_v20 = vpop.f32.mrf.mxu0  ;;  %v410_v21 = vpop.f32.mrf.mxu1 }
 0x143   :  { %v517_v22 = vmul.f32 %v509_v1, %v381_v20  ;;  %v521_v23 = vmul.f32 %v513_v17, %v410_v21  ;;  %v637_v20 = vlaneseq }
 0x145   :  { %v2599_v24 = vadd.f32 %v521_v23, %v517_v22  ;;  %v638_v21 = vshrl.u32 %v637_v20, 7  ;;  %v641_v22 = vand.u32 127, %v637_v20 }
 0x147   :  { %553 = vrot.lane.b32.xlu2 %v2599_v24, %s2391_s4  ;;  %545 = vrot.lane.b32.xlu0 %v2599_v24, %s2392_s7  ;;  %vm2660_vm10 = vcmp.ge.s32.totalorder %v638_v21, %v641_v22 }
 0x149   :  { %v439_v5 = vpop.f32.mrf.mxu2  ;;  %v468_v25 = vpop.f32.mrf.mxu3 }
 0x14a   :  { %v529_v26 = vmul.f32 %v509_v1, %v439_v5  ;;  %v533_v18 = vmul.f32 %v513_v17, %v468_v25  ;;  %v384_v19 = vpop.f32.mrf.mxu0  ;;  %v413_v27 = vpop.f32.mrf.mxu1 }
 0x14b   :  { %v518_v43 = vmul.f32 %v510_v31, %v384_v19  ;;  %v522_v44 = vmul.f32 %v514_v32, %v413_v27  ;;  %v639_v27 = vadd.s32 8, %v638_v21 }
 0x14c   :  { %v537_v28 = vadd.f32 %v533_v18, %v529_v26 }
 0x14d   :  { %v526_v48 = vadd.f32 %v522_v44, %v518_v43  ;;  %vm2673_vm12 = vcmp.ge.s32.totalorder %v639_v27, %v641_v22 }
 0x14f   :  { %573 = vrot.lane.b32.xlu2 %v537_v28, %s2392_s7 }
 0x151   :  { %v442_v33 = vpop.f32.mrf.mxu2  ;;  %v471_v34 = vpop.f32.mrf.mxu3 }
 0x152   :  { %v530_v35 = vmul.f32 %v510_v31, %v442_v33  ;;  %v534_v36 = vmul.f32 %v514_v32, %v471_v34  ;;  %v387_v37 = vpop.f32.mrf.mxu0  ;;  %v416_v38 = vpop.f32.mrf.mxu1 }
 0x153   :  { %v519_v39 = vmul.f32 %v511_v29, %v387_v37  ;;  %v523_v40 = vmul.f32 %v515_v30, %v416_v38 }
 0x154   :  { %v538_v41 = vadd.f32 %v534_v36, %v530_v35 }
 0x155   :  { %v527_v42 = vadd.f32 %v523_v40, %v519_v39 }
 0x156   :  { %583 = vrot.lane.b32.xlu1 %v538_v41, %s2391_s4  ;;  %1958 = vmatpush.xpose.msk.msrb.mxu1 %vm644_vm9, %v538_v41 }
 0x157   :  { %2022 = vmatpush.xpose.msk.msrb.mxu3 %vm644_vm9, %v538_v41  ;;  %581 = vrot.lane.b32.xlu2 %v537_v28, %s2391_s4 }
 0x158   :  { %549 = vrot.lane.b32.xlu0 %v527_v42, %s2392_s7 }
 0x159   :  { %v445_v46 = vpop.f32.mrf.mxu2  ;;  %v474_v47 = vpop.f32.mrf.mxu3 }
 0x15a   :  { %1959 = vmatpush.xpose.msk.msrb.mxu1 %vm644_vm9, %v537_v28  ;;  %v531_v57 = vmul.f32 %v511_v29, %v445_v46  ;;  %v535_v0 = vmul.f32 %v515_v30, %v474_v47  ;;  %v390_v60 = vpop.f32.mrf.mxu0  ;;  %v419_v61 = vpop.f32.mrf.mxu1 }
 0x15b   :  { %2023 = vmatpush.xpose.msk.msrb.mxu3 %vm644_vm9, %v537_v28  ;;  %v520_v62 = vmul.f32 %v512_v49, %v390_v60  ;;  %v524_v63 = vmul.f32 %v516_v52, %v419_v61 }
 0x15c   :  { %v539_v59 = vadd.f32 %v535_v0, %v531_v57 }
 0x15d   :  { %1960 = vmatmul.msk.f32.vlgmr.msrb.gmra.mxu1 %vm644_vm9, %v2599_v24  ;;  %v528_v2 = vadd.f32 %v524_v63, %v520_v62 }
 0x15e   :  { %1961 = vmatmul.msk.f32.vlgmr.msrb.gmra.mxu3 %vm644_vm9, %v526_v48  ;;  %555 = vrot.lane.b32.xlu1 %v526_v48, %s2391_s4 }
 0x15f   :  { %547 = vrot.lane.b32.xlu2 %v526_v48, %s2392_s7 }
 0x161   :  { %v448_v50 = vpop.f32.mrf.mxu2  ;;  %v477_v51 = vpop.f32.mrf.mxu3 }
 0x162   :  { %v532_v55 = vmul.f32 %v512_v49, %v448_v50  ;;  %v536_v56 = vmul.f32 %v516_v52, %v477_v51  ;;  %v497_v3 = vpop.f32.mrf.mxu0 }
 0x164   :  { %v540_v58 = vadd.f32 %v536_v56, %v532_v55 }
 0x166   :  { %1962 = vmatpush.xpose.msk.msra.mxu2 %vm644_vm9, %v540_v58  ;;  %589 = vrot.lane.b32.xlu1 %v537_v28, %s2383_s24 }
 0x167   :  { %579 = vrot.lane.b32.xlu0 %v540_v58, %s2392_s7  ;;  %575 = vrot.lane.b32.xlu2 %v538_v41, %s2392_s7 }
 0x169   :  { %v506_v8 = vpop.f32.mrf.mxu2 }
 0x16a   :  { %1963 = vmatpush.xpose.msk.msra.mxu2 %vm644_vm9, %v539_v59  ;;  %v500_v6 = vpop.f32.mrf.mxu0 }
 0x16b   :  { %v2635_v53 = vpack.i.bf16 %v497_v3, %v500_v6 }
 0x16d   :  { %1964 = vmatmul.msk.f32.vlgmr.msra.gmra.mxu2 %vm644_vm9, %v527_v42 }
 0x16e   :  { %585 = vrot.lane.b32.xlu1 %v539_v59, %s2391_s4 }
 0x16f   :  { %587 = vrot.lane.b32.xlu0 %v540_v58, %s2391_s4  ;;  %561 = vrot.lane.b32.xlu2 %v2599_v24, %s2383_s24 }
 0x172   :  { %v503_v7 = vpop.f32.mrf.mxu0 }
 0x173   :  { %v2641_v9 = vpack.i.bf16 %v503_v7, %v506_v8 }
 0x175   :  { %1965 = vmatmul.msk.f32.gmra.mxu2 %vm644_vm9, %v528_v2 }
 0x176   :  { %563 = vrot.lane.b32.xlu1 %v526_v48, %s2383_s24 }
 0x177   :  { %557 = vrot.lane.b32.xlu0 %v527_v42, %s2391_s4  ;;  %591 = vrot.lane.b32.xlu2 %v538_v41, %s2383_s24 }
 0x17e   :  { %593 = vrot.lane.b32.xlu1 %v539_v59, %s2383_s24 }
 0x17f   :  { %595 = vrot.lane.b32.xlu0 %v540_v58, %s2383_s24  ;;  %577 = vrot.lane.b32.xlu2 %v539_v59, %s2392_s7 }
 0x186   :  { %2047 = vrot.lane.b32.xlu1 %v2635_v53, %s2391_s4 }
 0x187   :  { %565 = vrot.lane.b32.xlu0 %v527_v42, %s2383_s24  ;;  %551 = vrot.lane.b32.xlu2 %v528_v2, %s2392_s7 }
 0x18e   :  { %2052 = vrot.lane.b32.xlu1 %v2641_v9, %s2392_s7 }
 0x18f   :  { %2042 = vrot.lane.b32.xlu0 %v2635_v53, %s2392_s7  ;;  %559 = vrot.lane.b32.xlu2 %v528_v2, %s2391_s4 }
 0x197   :  { %567 = vrot.lane.b32.xlu2 %v528_v2, %s2383_s24 }
 0x1a1   :  { %v554_v10 = vpop.permute.xlu2 %553 }
 0x1a9   :  { %v574_v54 = vpop.permute.xlu2 %573 }
 0x1b1   :  { %v582_v11 = vpop.permute.xlu2 %581 }
 0x1b9   :  { %v548_v4 = vpop.permute.xlu2 %547  ;;  %v546_v13 = vpop.permute.xlu0 %545 }
 0x1c1   :  { %v576_v12 = vpop.permute.xlu2 %575 }
 0x1c2   :  { %1966 = vmatpush.xpose.msk.msra.mxu3 %vm644_vm9, %v576_v12 }
 0x1c6   :  { %1967 = vmatpush.xpose.msk.msra.mxu3 %vm644_vm9, %v574_v54 }
 0x1c8   :  { %v584_v14 = vpop.permute.xlu1 %583 }
 0x1c9   :  { %1974 = vmatpush.xpose.msk.msrb.mxu2 %vm644_vm9, %v584_v14  ;;  %v562_v15 = vpop.permute.xlu2 %561  ;;  %1968 = vmatmul.msk.f32.vlgmr.msra.gmra.mxu3 %vm644_vm9, %v546_v13 }
 0x1ca   :  { %v550_v1 = vpop.permute.xlu0 %549 }
 0x1cd   :  { %1975 = vmatpush.xpose.msk.msrb.mxu2 %vm644_vm9, %v582_v11 }
 0x1d0   :  { %v556_v16 = vpop.permute.xlu1 %555  ;;  %1976 = vmatmul.msk.f32.vlgmr.msrb.gmra.mxu2 %vm644_vm9, %v554_v10 }
 0x1d1   :  { %1126 = vmatpush.msra.mxu2 %v500_v6  ;;  %v592_v17 = vpop.permute.xlu2 %591  ;;  %1969 = vmatmul.msk.f32.gmra.mxu3 %vm644_vm9, %v548_v4 }
 0x1d2   :  { %1982 = vmatpush.xpose.msk.msra.mxu0 %vm644_vm9, %v592_v17 }
 0x1d3   :  { %1127 = vmatpush.msra.mxu2 %v497_v3 }
 0x1d8   :  { %v590_v23 = vpop.permute.xlu1 %589  ;;  %1977 = vmatmul.msk.f32.gmra.mxu2 %vm644_vm9, %v556_v16 }
 0x1d9   :  { %v580_v24 = vpop.permute.xlu0 %579  ;;  %1983 = vmatpush.xpose.msk.msra.mxu0 %vm644_vm9, %v590_v23  ;;  %v578_v18 = vpop.permute.xlu2 %577 }
 0x1da   :  { %1970 = vmatpush.xpose.msk.msra.mxu1 %vm644_vm9, %v580_v24  ;;  %v670_v5 = vpop.f32.mrf.mxu1 }
 0x1db   :  { %v893_v26 = vmul.f32 0.17677669, %v670_v5 }
 0x1dc   :  { %1984 = vmatmul.msk.f32.vlgmr.msra.gmra.mxu0 %vm644_vm9, %v562_v15 }
 0x1dd   :  { %v2667_v19 = vsel %vm2660_vm10, %v893_v26, -inf }
 0x1de   :  { %1971 = vmatpush.xpose.msk.msra.mxu1 %vm644_vm9, %v578_v18  ;;  %v930_v28 = vsel %vm929_vm11, %v2667_v19, -inf }
 0x1df   :  { %931 = vmax.xlane.f32.xlu1 %v930_v28 }
 0x1e0   :  { %v586_v29 = vpop.permute.xlu1 %585 }
 0x1e1   :  { %v673_v30 = vpop.f32.mrf.mxu3  ;;  %1972 = vmatmul.msk.f32.vlgmr.msra.gmra.mxu1 %vm644_vm9, %v550_v1  ;;  %v588_v31 = vpop.permute.xlu0 %587 }
 0x1e2   :  { %v894_v33 = vmul.f32 0.17677669, %v673_v30  ;;  %1978 = vmatpush.xpose.msk.msrb.mxu3 %vm644_vm9, %v588_v31  ;;  %v552_v36 = vpop.permute.xlu2 %551 }
 0x1e4   :  { %v2680_v34 = vsel %vm2673_vm12, %v894_v33, -inf }
 0x1e5   :  { %v933_v35 = vsel %vm929_vm11, %v2680_v34, -inf }
 0x1e6   :  { %934 = vmax.xlane.f32.xlu2 %v933_v35  ;;  %1979 = vmatpush.xpose.msk.msrb.mxu3 %vm644_vm9, %v586_v29 }
 0x1e8   :  { %v564_v37 = vpop.permute.xlu1 %563 }
 0x1e9   :  { %1973 = vmatmul.msk.f32.gmra.mxu1 %vm644_vm9, %v552_v36  ;;  %v558_v38 = vpop.permute.xlu0 %557  ;;  %1985 = vmatmul.msk.f32.gmra.mxu0 %vm644_vm9, %v564_v37 }
 0x1ea   :  { %1155 = vmatpush.msra.mxu3 %v506_v8  ;;  %v560_v41 = vpop.permute.xlu2 %559 }
 0x1eb   :  { %1980 = vmatmul.msk.f32.vlgmr.msrb.gmra.mxu3 %vm644_vm9, %v558_v38 }
 0x1ec   :  { %1156 = vmatpush.msra.mxu3 %v503_v7 }
 0x1f0   :  { %v594_v39 = vpop.permute.xlu1 %593  ;;  %v701_v40 = vpop.f32.mrf.mxu2 }
 0x1f1   :  { %v895_v42 = vmul.f32 0.17677669, %v701_v40  ;;  %v596_v43 = vpop.permute.xlu0 %595 }
 0x1f2   :  { %1986 = vmatpush.xpose.msk.msrb.mxu1 %vm644_vm9, %v596_v43  ;;  %v568_v0 = vpop.permute.xlu2 %567 }
 0x1f3   :  { %1981 = vmatmul.msk.f32.gmra.mxu3 %vm644_vm9, %v560_v41  ;;  %v2692_v44 = vsel %vm2660_vm10, %v895_v42, -inf }
 0x1f4   :  { %v936_v46 = vsel %vm929_vm11, %v2692_v44, -inf }
 0x1f5   :  { %937 = vmax.xlane.f32.xlu0 %v936_v46 }
 0x1f6   :  { %1987 = vmatpush.xpose.msk.msrb.mxu1 %vm644_vm9, %v594_v39 }
 0x1f8   :  { %v704_v47 = vpop.f32.mrf.mxu2  ;;  %v2048_v48 = vpop.permute.xlu1 %2047 }
 0x1f9   :  { %v896_v49 = vmul.f32 0.17677669, %v704_v47  ;;  %v2049_v50 = vunpack.i.l.bf16 %v2048_v48  ;;  %v566_v51 = vpop.permute.xlu0 %565  ;;  %v2050_v52 = vunpack.i.h.bf16 %v2048_v48 }
 0x1fa   :  { %1988 = vmatmul.msk.f32.vlgmr.msrb.gmra.mxu1 %vm644_vm9, %v566_v51 }
 0x1fb   :  { %1242 = vmatpush.msrb.mxu2 %v2049_v50  ;;  %v2700_v55 = vsel %vm2673_vm12, %v896_v49, -inf }
 0x1fc   :  { %v939_v56 = vsel %vm929_vm11, %v2700_v55, -inf }
 0x1fd   :  { %940 = vmax.xlane.f32.xlu2 %v939_v56  ;;  %1243 = vmatpush.msrb.mxu2 %v2050_v52 }
 0x200   :  { %v2053_v57 = vpop.permute.xlu1 %2052 }
 0x201   :  { %v2054_v58 = vunpack.i.l.bf16 %v2053_v57  ;;  %v2043_v59 = vpop.permute.xlu0 %2042  ;;  %v2055_v61 = vunpack.i.h.bf16 %v2053_v57 }
 0x202   :  { %v2044_v60 = vunpack.i.l.bf16 %v2043_v59  ;;  %1989 = vmatmul.msk.f32.gmra.mxu1 %vm644_vm9, %v568_v0  ;;  %v2045_v62 = vunpack.i.h.bf16 %v2043_v59 }
 0x203   :  { %1213 = vmatpush.msra.mxu1 %v2054_v58 }
 0x204   :  { %1184 = vmatpush.msrb.mxu0 %v2044_v60 }
 0x205   :  { %1214 = vmatpush.msra.mxu1 %v2055_v61 }
 0x206   :  { %1185 = vmatpush.msrb.mxu0 %v2045_v62 }
 0x24c   :  { %v732_v63 = vpop.f32.mrf.mxu3 }
 0x24d   :  { %v897_v21 = vmul.f32 0.17677669, %v732_v63 }
 0x252   :  { %v932_v4 = vpop.xlane.xlu1 %931 }
 0x253   :  { %v794_v2 = vpop.f32.mrf.mxu2  ;;  %v978_v15 = vsub.f32 %v2667_v19, %v932_v4  ;;  %v2733_v19 = vsel %vm2660_vm10, %v897_v21, -inf }
 0x254   :  { %v901_v3 = vmul.f32 0.17677669, %v794_v2  ;;  %v735_v6 = vpop.f32.mrf.mxu3  ;;  %v942_v28 = vsel %vm929_vm11, %v2733_v19, -inf }
 0x255   :  { %v898_v7 = vmul.f32 0.17677669, %v735_v6  ;;  %v994_v5 = vmul.f32 1.442695, %v978_v15 }
 0x256   :  { %v2707_v8 = vsel %vm2660_vm10, %v901_v3, -inf }
 0x257   :  { %v954_v10 = vsel %vm929_vm11, %v2707_v8, -inf  ;;  %v2713_v54 = vsel %vm2673_vm12, %v898_v7, -inf  ;;  %2091 = vpow2.f32 %v994_v5 }
 0x258   :  { %955 = vmax.xlane.f32.xlu2 %v954_v10  ;;  %v945_v11 = vsel %vm929_vm11, %v2713_v54, -inf }
 0x259   :  { %v856_v12 = vpop.f32.mrf.mxu0  ;;  %946 = vmax.xlane.f32.xlu1 %v945_v11  ;;  %v935_v16 = vpop.xlane.xlu2 %934 }
 0x25a   :  { %v905_v13 = vmul.f32 0.17677669, %v856_v12  ;;  %v979_v24 = vsub.f32 %v2680_v34, %v935_v16 }
 0x25b   :  { %v797_v14 = vpop.f32.mrf.mxu2 }
 0x25c   :  { %v902_v1 = vmul.f32 0.17677669, %v797_v14  ;;  %v2720_v17 = vsel %vm2660_vm10, %v905_v13, -inf  ;;  %v996_v27 = vmul.f32 1.442695, %v979_v24 }
 0x25d   :  { %v966_v20 = vsel %vm929_vm11, %v2720_v17, -inf  ;;  %v2743_v34 = vpop.eup %2091 }
 0x25e   :  { %v763_v22 = vpop.f32.mrf.mxu1  ;;  %967 = vmax.xlane.f32.xlu0 %v966_v20  ;;  %v2726_v23 = vsel %vm2673_vm12, %v902_v1, -inf  ;;  %2093 = vpow2.f32 %v996_v27  ;;  %v1026_v41 = vsel %vm929_vm11, %v2743_v34, 0.0 }
 0x25f   :  { %v957_v26 = vsel %vm929_vm11, %v2726_v23, -inf  ;;  %v899_v18 = vmul.f32 0.17677669, %v763_v22 }
 0x261   :  { %958 = vmax.xlane.f32.xlu1 %v957_v26  ;;  %v2739_v29 = vsel %vm2660_vm10, %v899_v18, -inf }
 0x262   :  { %v948_v33 = vsel %vm929_vm11, %v2739_v29, -inf }
 0x264   :  { %v2751_v39 = vpop.eup %2093 }
 0x265   :  { %v1029_v47 = vsel %vm929_vm11, %v2751_v39, 0.0 }
 0x266   :  { %943 = vmax.xlane.f32.xlu0 %v942_v28  ;;  %v859_v30 = vpop.f32.mrf.mxu0  ;;  %v766_v36 = vpop.f32.mrf.mxu1 }
 0x267   :  { %v906_v31 = vmul.f32 0.17677669, %v859_v30  ;;  %v900_v42 = vmul.f32 0.17677669, %v766_v36 }
 0x268   :  { %v938_v38 = vpop.xlane.xlu0 %937 }
 0x269   :  { %949 = vmax.xlane.f32.xlu1 %v948_v33  ;;  %v2747_v35 = vsel %vm2673_vm12, %v906_v31, -inf  ;;  %v980_v43 = vsub.f32 %v2692_v44, %v938_v38  ;;  %v2761_v50 = vsel %vm2673_vm12, %v900_v42, -inf }
 0x26a   :  { %v969_v37 = vsel %vm929_vm11, %v2747_v35, -inf  ;;  %v951_v57 = vsel %vm929_vm11, %v2761_v50, -inf }
 0x26b   :  { %970 = vmax.xlane.f32.xlu2 %v969_v37  ;;  %v998_v51 = vmul.f32 1.442695, %v980_v43 }
 0x26d   :  { %2095 = vpow2.f32 %v998_v51 }
 0x26e   :  { %v825_v40 = vpop.f32.mrf.mxu3  ;;  %1027 = vadd.xlane.f32.xlu0 %v1026_v41 }
 0x26f   :  { %v903_v48 = vmul.f32 0.17677669, %v825_v40 }
 0x270   :  { %v941_v46 = vpop.xlane.xlu2 %940 }
 0x271   :  { %v981_v49 = vsub.f32 %v2700_v55, %v941_v46  ;;  %1030 = vadd.xlane.f32.xlu1 %v1029_v47  ;;  %v2767_v44 = vsel %vm2660_vm10, %v903_v48, -inf }
 0x272   :  { %v960_v60 = vsel %vm929_vm11, %v2767_v44, -inf }
 0x273   :  { %v1000_v52 = vmul.f32 1.442695, %v981_v49  ;;  %v2781_v63 = vpop.eup %2095 }
 0x274   :  { %v1032_v7 = vsel %vm929_vm11, %v2781_v63, 0.0 }
 0x275   :  { %2097 = vpow2.f32 %v1000_v52 }
 0x276   :  { %v828_v56 = vpop.f32.mrf.mxu3  ;;  %952 = vmax.xlane.f32.xlu0 %v951_v57 }
 0x277   :  { %v904_v0 = vmul.f32 0.17677669, %v828_v56  ;;  %v887_v58 = vpop.f32.mrf.mxu1 }
 0x278   :  { %v907_v55 = vmul.f32 0.17677669, %v887_v58 }
 0x279   :  { %v2771_v59 = vsel %vm2673_vm12, %v904_v0, -inf  ;;  %961 = vmax.xlane.f32.xlu1 %v960_v60 }
 0x27a   :  { %v963_v61 = vsel %vm929_vm11, %v2771_v59, -inf  ;;  %v2779_v62 = vsel %vm2660_vm10, %v907_v55, -inf }
 0x27b   :  { %964 = vmax.xlane.f32.xlu2 %v963_v61  ;;  %v972_v2 = vsel %vm929_vm11, %v2779_v62, -inf  ;;  %v2785_v3 = vpop.eup %2097 }
 0x27c   :  { %v1035_v11 = vsel %vm929_vm11, %v2785_v3, 0.0 }
 0x27e   :  { %973 = vmax.xlane.f32.xlu0 %v972_v2 }
 0x27f   :  { %v890_v6 = vpop.f32.mrf.mxu1 }
 0x280   :  { %v908_v10 = vmul.f32 0.17677669, %v890_v6 }
 0x281   :  { %1033 = vadd.xlane.f32.xlu1 %v1032_v7 }
 0x282   :  { %v2793_v25 = vsel %vm2673_vm12, %v908_v10, -inf }
 0x283   :  { %1036 = vadd.xlane.f32.xlu2 %v1035_v11  ;;  %v975_v4 = vsel %vm929_vm11, %v2793_v25, -inf }
 0x289   :  { %976 = vmax.xlane.f32.xlu1 %v975_v4 }
 0x2cb   :  { %v956_v1 = vpop.xlane.xlu2 %955 }
 0x2cc   :  { %v947_v12 = vpop.xlane.xlu1 %946  ;;  %v986_v22 = vsub.f32 %v2707_v8, %v956_v1 }
 0x2cd   :  { %v983_v8 = vsub.f32 %v2713_v54, %v947_v12 }
 0x2ce   :  { %v1010_v18 = vmul.f32 1.442695, %v986_v22 }
 0x2cf   :  { %v1004_v37 = vmul.f32 1.442695, %v983_v8 }
 0x2d1   :  { %v968_v13 = vpop.xlane.xlu0 %967 }
 0x2d2   :  { %v990_v14 = vsub.f32 %v2720_v17, %v968_v13 }
 0x2d4   :  { %v1018_v15 = vmul.f32 1.442695, %v990_v14  ;;  %v959_v16 = vpop.xlane.xlu1 %958 }
 0x2d5   :  { %v987_v43 = vsub.f32 %v2726_v23, %v959_v16 }
 0x2d6   :  { %2099 = vpow2.f32 %v1018_v15 }
 0x2d7   :  { %v1012_v51 = vmul.f32 1.442695, %v987_v43 }
 0x2d9   :  { %v944_v20 = vpop.xlane.xlu0 %943 }
 0x2da   :  { %v982_v21 = vsub.f32 %v2733_v19, %v944_v20 }
 0x2dc   :  { %v2800_v32 = vpop.eup %2099  ;;  %v1002_v24 = vmul.f32 1.442695, %v982_v21  ;;  %v950_v5 = vpop.xlane.xlu1 %949 }
 0x2dd   :  { %v1062_v26 = vsel %vm929_vm11, %v2800_v32, 0.0  ;;  %v984_v23 = vsub.f32 %v2739_v29, %v950_v5 }
 0x2de   :  { %2101 = vpow2.f32 %v1002_v24  ;;  %1063 = vadd.xlane.f32.xlu0 %v1062_v26  ;;  %v971_v17 = vpop.xlane.xlu2 %970 }
 0x2df   :  { %v991_v27 = vsub.f32 %v2747_v35, %v971_v17  ;;  %v1006_v61 = vmul.f32 1.442695, %v984_v23 }
 0x2e1   :  { %v1028_v28 = vpop.xlane.xlu0 %1027  ;;  %v1020_v30 = vmul.f32 1.442695, %v991_v27 }
 0x2e2   :  { %2103 = vrcp.f32 %v1028_v28 }
 0x2e3   :  { %2105 = vpow2.f32 %v1010_v18 }
 0x2e4   :  { %v2805_v19 = vpop.eup %2101  ;;  %2107 = vpow2.f32 %v1020_v30  ;;  %v1031_v31 = vpop.xlane.xlu1 %1030 }
 0x2e5   :  { %v1038_v33 = vsel %vm929_vm11, %v2805_v19, 0.0  ;;  %2109 = vrcp.f32 %v1031_v31 }
 0x2e6   :  { %1039 = vadd.xlane.f32.xlu2 %v1038_v33  ;;  %2111 = vpow2.f32 %v1004_v37 }
 0x2e8   :  { %v2104_v36 = vpop.eup %2103 }
 0x2e9   :  { %v2810_v38 = vpop.eup %2105  ;;  %v1090_v35 = vmul.f32 %v2104_v36, %v2743_v34  ;;  %v953_v40 = vpop.xlane.xlu0 %952 }
 0x2ea   :  { %v2813_v41 = vpop.eup %2107  ;;  %v985_v42 = vsub.f32 %v2761_v50, %v953_v40  ;;  %v1050_v48 = vsel %vm929_vm11, %v2810_v38, 0.0 }
 0x2eb   :  { %v1065_v54 = vsel %vm929_vm11, %v2813_v41, 0.0  ;;  %1990 = vmatmul.msk.f32.vlgmr.msra.gmra.mxu2 %vm929_vm11, %v1090_v35  ;;  %v2110_v34 = vpop.eup %2109 }
 0x2ec   :  { %v1008_v46 = vmul.f32 1.442695, %v985_v42  ;;  %1066 = vadd.xlane.f32.xlu0 %v1065_v54  ;;  %v962_v47 = vpop.xlane.xlu1 %961  ;;  %v1091_v52 = vmul.f32 %v2110_v34, %v2751_v39  ;;  %v2823_v56 = vpop.eup %2111 }
 0x2ed   :  { %v1041_v60 = vsel %vm929_vm11, %v2823_v56, 0.0 }
 0x2ee   :  { %2113 = vpow2.f32 %v1008_v46  ;;  %1051 = vadd.xlane.f32.xlu2 %v1050_v48  ;;  %v965_v49 = vpop.xlane.xlu2 %964 }
 0x2ef   :  { %2115 = vpow2.f32 %v1012_v51 }
 0x2f1   :  { %v974_v50 = vpop.xlane.xlu0 %973 }
 0x2f2   :  { %v992_v57 = vsub.f32 %v2779_v62, %v974_v50 }
 0x2f3   :  { %1991 = vmatmul.msk.f32.gmra.mxu2 %vm929_vm11, %v1091_v52 }
 0x2f4   :  { %v2828_v0 = vpop.eup %2113  ;;  %v1022_v58 = vmul.f32 1.442695, %v992_v57  ;;  %v1034_v55 = vpop.xlane.xlu1 %1033 }
 0x2f5   :  { %2117 = vrcp.f32 %v1034_v55  ;;  %v1047_v39 = vsel %vm929_vm11, %v2828_v0, 0.0  ;;  %v2834_v29 = vpop.eup %2115 }
 0x2f6   :  { %2119 = vpow2.f32 %v1022_v58  ;;  %1042 = vadd.xlane.f32.xlu2 %v1041_v60  ;;  %1048 = vadd.xlane.f32.xlu1 %v1047_v39  ;;  %v1037_v62 = vpop.xlane.xlu2 %1036  ;;  %v1053_v10 = vsel %vm929_vm11, %v2834_v29, 0.0 }
 0x2f7   :  { %2121 = vpow2.f32 %v1006_v61 }
 0x2f8   :  { %2123 = vrcp.f32 %v1037_v62 }
 0x2fb   :  { %v2118_v2 = vpop.eup %2117 }
 0x2fc   :  { %v2836_v6 = vpop.eup %2119  ;;  %v1092_v7 = vmul.f32 %v2118_v2, %v2781_v63  ;;  %v989_v63 = vsub.f32 %v2771_v59, %v965_v49  ;;  %v977_v21 = vpop.xlane.xlu1 %976 }
 0x2fd   :  { %v1068_v11 = vsel %vm929_vm11, %v2836_v6, 0.0  ;;  %v2122_v4 = vpop.eup %2121 }
 0x2fe   :  { %1054 = vadd.xlane.f32.xlu2 %v1053_v10  ;;  %1069 = vadd.xlane.f32.xlu1 %v1068_v11  ;;  %v2124_v12 = vpop.eup %2123  ;;  %v1044_v13 = vsel %vm929_vm11, %v2122_v4, 0.0  ;;  %v1016_v15 = vmul.f32 1.442695, %v989_v63 }
 0x2ff   :  { %1992 = vmatmul.msk.f32.vlgmr.msra.gmra.mxu3 %vm929_vm11, %v1092_v7  ;;  %v1093_v14 = vmul.f32 %v2124_v12, %v2785_v3  ;;  %v988_v3 = vsub.f32 %v2767_v44, %v962_v47 }
 0x300   :  { %2062 = vrot.lane.b32.xlu0 %v2641_v9, %s2391_s4  ;;  %2125 = vpow2.f32 %v1016_v15 }
 0x301   :  { %v1014_v20 = vmul.f32 1.442695, %v988_v3 }
 0x303   :  { %2127 = vpow2.f32 %v1014_v20 }
 0x306   :  { %1045 = vadd.xlane.f32.xlu2 %v1044_v13  ;;  %v2854_v16 = vpop.eup %2125 }
 0x307   :  { %1993 = vmatmul.msk.f32.gmra.mxu3 %vm929_vm11, %v1093_v14  ;;  %v1059_v1 = vsel %vm929_vm11, %v2854_v16, 0.0 }
 0x309   :  { %v2860_v59 = vpop.eup %2127 }
 0x317   :  { %2067 = vrot.lane.b32.xlu1 %v2641_v9, %s2383_s24  ;;  %v993_v9 = vsub.f32 %v2793_v25, %v977_v21 }
 0x319   :  { %v1024_v22 = vmul.f32 1.442695, %v993_v9 }
 0x31b   :  { %2129 = vpow2.f32 %v1024_v22 }
 0x31e   :  { %2057 = vrot.lane.b32.xlu2 %v2635_v53, %s2383_s24  ;;  %v1056_v53 = vsel %vm929_vm11, %v2860_v59, 0.0 }
 0x321   :  { %v2864_v24 = vpop.eup %2129 }
 0x322   :  { %v1071_v5 = vsel %vm929_vm11, %v2864_v24, 0.0 }
 0x32a   :  { %1060 = vadd.xlane.f32.xlu0 %v1059_v1 }
 0x347   :  { %1057 = vadd.xlane.f32.xlu2 %v1056_v53 }
 0x34f   :  { %1072 = vadd.xlane.f32.xlu2 %v1071_v5 }
 0x351   :  { %v1064_v17 = vpop.xlane.xlu0 %1063 }
 0x359   :  { %v1040_v44 = vpop.xlane.xlu2 %1039 }
 0x35a   :  { %2131 = vrcp.f32 %v1040_v44 }
 0x35f   :  { %v1067_v8 = vpop.xlane.xlu0 %1066 }
 0x360   :  { %v2132_v26 = vpop.eup %2131 }
 0x361   :  { %v1094_v18 = vmul.f32 %v2132_v26, %v2805_v19  ;;  %v1052_v25 = vpop.xlane.xlu2 %1051 }
 0x362   :  { %2133 = vrcp.f32 %v1052_v25 }
 0x363   :  { %1994 = vmatmul.msk.f32.vlgmr.msrb.gmra.mxu0 %vm929_vm11, %v1094_v18 }
 0x368   :  { %v2134_v27 = vpop.eup %2133 }
 0x369   :  { %v1098_v28 = vmul.f32 %v2134_v27, %v2810_v38  ;;  %v1043_v30 = vpop.xlane.xlu2 %1042  ;;  %v1049_v40 = vpop.xlane.xlu1 %1048 }
 0x36a   :  { %2135 = vrcp.f32 %v1043_v30 }
 0x36b   :  { %1998 = vmatmul.msk.f32.vlgmr.msrb.gmra.mxu2 %vm929_vm11, %v1098_v28 }
 0x370   :  { %v2136_v31 = vpop.eup %2135 }
 0x371   :  { %v1055_v33 = vpop.xlane.xlu2 %1054  ;;  %v1095_v36 = vmul.f32 %v2136_v31, %v2823_v56  ;;  %v1070_v46 = vpop.xlane.xlu1 %1069 }
 0x372   :  { %2137 = vrcp.f32 %v1055_v33  ;;  %v2063_v37 = vpop.permute.xlu0 %2062 }
 0x373   :  { %v2064_v19 = vunpack.i.l.bf16 %v2063_v37  ;;  %1995 = vmatmul.msk.f32.gmra.mxu0 %vm929_vm11, %v1095_v36  ;;  %v2065_v35 = vunpack.i.h.bf16 %v2063_v37 }
 0x375   :  { %1271 = vmatpush.msrb.mxu3 %v2064_v19  ;;  %v2172_v19 = vld [vmem:[#allocation2 + $0x8] sm:$0xff] }
 0x377   :  { %1272 = vmatpush.msrb.mxu3 %v2065_v35 }
 0x378   :  { %v2138_v42 = vpop.eup %2137 }
 0x379   :  { %v1046_v38 = vpop.xlane.xlu2 %1045  ;;  %v1099_v54 = vmul.f32 %v2138_v42, %v2834_v29 }
 0x37a   :  { %2139 = vrcp.f32 %v1046_v38 }
 0x37b   :  { %1999 = vmatmul.msk.f32.gmra.mxu2 %vm929_vm11, %v1099_v54  ;;  %2141 = vrcp.f32 %v1064_v17  ;;  %v2171_v17 = vld [vmem:[#allocation2] sm:$0xff] }
 0x37c   :  { %2143 = vrcp.f32 %v1049_v40 }
 0x37d   :  { %2145 = vrcp.f32 %v1067_v8 }
 0x37e   :  { %2147 = vrcp.f32 %v1070_v46 }
 0x380   :  { %v2140_v43 = vpop.eup %2139 }
 0x381   :  { %v1096_v47 = vmul.f32 %v2140_v43, %v2122_v4  ;;  %v2058_v48 = vpop.permute.xlu2 %2057  ;;  %v2142_v34 = vpop.eup %2141 }
 0x382   :  { %v2059_v49 = vunpack.i.l.bf16 %v2058_v48  ;;  %v2060_v51 = vunpack.i.h.bf16 %v2058_v48  ;;  %v1102_v50 = vmul.f32 %v2142_v34, %v2800_v32  ;;  %v2144_v52 = vpop.eup %2143  ;;  %v1158_v21 = vpop.f32.mrf.mxu3  ;;  %v2173_v48 = vld [vmem:[#allocation2 + $0x10] sm:$0xff] }
 0x383   :  { %1996 = vmatmul.msk.f32.vlgmr.msra.gmra.mxu1 %vm929_vm11, %v1096_v47  ;;  %v1097_v57 = vmul.f32 %v2144_v52, %v2828_v0  ;;  %v2146_v23 = vpop.eup %2145 }
 0x384   :  { %1300 = vmatpush.msra.mxu0 %v2059_v49  ;;  %v1103_v60 = vmul.f32 %v2146_v23, %v2813_v41  ;;  %v2148_v39 = vpop.eup %2147 }
 0x385   :  { %v1104_v32 = vmul.f32 %v2148_v39, %v2836_v6  ;;  %v1129_v6 = vpop.f32.mrf.mxu2  ;;  %v1600_v39 = vld [vmem:[#allocation11 + $0x1e0] sm:$0xff] }
 0x386   :  { %1301 = vmatpush.msra.mxu0 %v2060_v51  ;;  %1604 = vmatpush.msra.mxu2 %v1600_v39 }
 0x387   :  { %2002 = vmatmul.msk.f32.vlgmr.msra.gmra.mxu0 %vm929_vm11, %v1102_v50 }
 0x389   :  { %v2068_v56 = vpop.permute.xlu1 %2067 }
 0x38a   :  { %v2069_v58 = vunpack.i.l.bf16 %v2068_v56  ;;  %v2070_v55 = vunpack.i.h.bf16 %v2068_v56  ;;  %v1161_v9 = vpop.f32.mrf.mxu3 }
 0x38b   :  { %1997 = vmatmul.msk.f32.gmra.mxu1 %vm929_vm11, %v1097_v57 }
 0x38c   :  { %1329 = vmatpush.msrb.mxu1 %v2069_v58  ;;  %v2174_v58 = vld [vmem:[#allocation2 + $0x18] sm:$0xff] }
 0x38d   :  { %v1132_v12 = vpop.f32.mrf.mxu2 }
 0x38e   :  { %1330 = vmatpush.msrb.mxu1 %v2070_v55 }
 0x38f   :  { %2003 = vmatmul.msk.f32.gmra.mxu0 %vm929_vm11, %v1103_v60 }
 0x393   :  { %2004 = vmatmul.msk.f32.vlgmr.msrb.gmra.mxu1 %vm929_vm11, %v1104_v32  ;;  %v1601_v32 = vld [vmem:[#allocation11 + $0x1e8] sm:$0xff] }
 0x394   :  { %1633 = vmatpush.msra.mxu3 %v1601_v32  ;;  %v1550_v32 = vld [vmem:[#allocation11 + $0x50] sm:$0xff] }
 0x39d   :  { %v1061_v62 = vpop.xlane.xlu0 %1060 }
 0x3ba   :  { %v1058_v61 = vpop.xlane.xlu2 %1057 }
 0x3bb   :  { %2149 = vrcp.f32 %v1058_v61  ;;  %v1602_v61 = vld [vmem:[#allocation11 + $0x1f0] sm:$0xff] }
 0x3bc   :  { %2151 = vrcp.f32 %v1061_v62  ;;  %v1603_v62 = vld [vmem:[#allocation11 + $0x1f8] sm:$0xff]  ;;  %1662 = vmatpush.msrb.mxu0 %v1602_v61 }
 0x3bd   :  { %1691 = vmatpush.msra.mxu1 %v1603_v62  ;;  %v1551_v61 = vld [vmem:[#allocation11 + $0x58] sm:$0xff]  ;;  %v1544_v62 = vld [vmem:[#allocation11 + $0x20] sm:$0xff] }
 0x3c1   :  { %v2150_v0 = vpop.eup %2149 }
 0x3c2   :  { %v1100_v29 = vmul.f32 %v2150_v0, %v2860_v59  ;;  %v1073_v2 = vpop.xlane.xlu2 %1072  ;;  %v2152_v41 = vpop.eup %2151  ;;  %v1596_v0 = vld [vmem:[#allocation11 + $0x1c0] sm:$0xff] }
 0x3c3   :  { %2153 = vrcp.f32 %v1073_v2  ;;  %v1101_v10 = vmul.f32 %v2152_v41, %v2854_v16  ;;  %v1598_v2 = vld [vmem:[#allocation11 + $0x1d0] sm:$0xff]  ;;  %1605 = vmatpush.msra.mxu2 %v1596_v0  ;;  %v1599_v41 = vld [vmem:[#allocation11 + $0x1d8] sm:$0xff]  ;;  %v1545_v0 = vld [vmem:[#allocation11 + $0x28] sm:$0xff] }
 0x3c4   :  { %2000 = vmatmul.msk.f32.vlgmr.msrb.gmra.mxu3 %vm929_vm11, %v1100_v29  ;;  %v1597_v29 = vld [vmem:[#allocation11 + $0x1c8] sm:$0xff]  ;;  %1663 = vmatpush.msrb.mxu0 %v1598_v2  ;;  %v1546_v2 = vld [vmem:[#allocation11 + $0x30] sm:$0xff] }
 0x3c5   :  { %1634 = vmatpush.msra.mxu3 %v1597_v29  ;;  %1692 = vmatpush.msra.mxu1 %v1599_v41  ;;  %v1547_v41 = vld [vmem:[#allocation11 + $0x38] sm:$0xff] }
 0x3c9   :  { %v2154_v7 = vpop.eup %2153 }
 0x3ca   :  { %v1105_v11 = vmul.f32 %v2154_v7, %v2864_v24  ;;  %v1592_v7 = vld [vmem:[#allocation11 + $0x1a0] sm:$0xff] }
 0x3cb   :  { %1606 = vmatpush.msra.mxu2 %v1592_v7 }
 0x3cc   :  { %2001 = vmatmul.msk.f32.gmra.mxu3 %vm929_vm11, %v1101_v10  ;;  %2005 = vmatmul.msk.f32.gmra.mxu1 %vm929_vm11, %v1105_v11  ;;  %v1593_v10 = vld [vmem:[#allocation11 + $0x1a8] sm:$0xff]  ;;  %v1594_v11 = vld [vmem:[#allocation11 + $0x1b0] sm:$0xff] }
 0x3cd   :  { %1635 = vmatpush.msra.mxu3 %v1593_v10  ;;  %1664 = vmatpush.msrb.mxu0 %v1594_v11  ;;  %v1540_v10 = vld [vmem:[#allocation11] sm:$0xff]  ;;  %v1541_v11 = vld [vmem:[#allocation11 + $0x8] sm:$0xff] }
 0x3e0   :  { %v1187_v4 = vpop.f32.mrf.mxu0 }
 0x3e1   :  { %1342 = vrot.lane.b32.xlu2 %v1187_v4, %s2383_s24  ;;  %v1588_v4 = vld [vmem:[#allocation11 + $0x180] sm:$0xff] }
 0x3e2   :  { %1607 = vmatpush.msra.mxu2 %v1588_v4 }
 0x3ee   :  { %v1245_v13 = vpop.f32.mrf.mxu2 }
 0x3ef   :  { %1358 = vrot.lane.b32.xlu1 %v1245_v13, %s2391_s4  ;;  %v1590_v13 = vld [vmem:[#allocation11 + $0x190] sm:$0xff] }
 0x3f0   :  { %v1190_v14 = vpop.f32.mrf.mxu0  ;;  %1665 = vmatpush.msrb.mxu0 %v1590_v13 }
 0x3f1   :  { %1344 = vrot.lane.b32.xlu0 %v1190_v14, %s2383_s24  ;;  %v1591_v14 = vld [vmem:[#allocation11 + $0x198] sm:$0xff] }
 0x3fe   :  { %v1248_v1 = vpop.f32.mrf.mxu2 }
 0x400   :  { %v1216_v63 = vpop.f32.mrf.mxu1 }
 0x404   :  { %v1303_v15 = vpop.f32.mrf.mxu0 }
 0x405   :  { %1374 = vrot.lane.b32.xlu1 %v1303_v15, %s2392_s7  ;;  %v1585_v15 = vld [vmem:[#allocation11 + $0x168] sm:$0xff] }
 0x408   :  { %v1219_v16 = vpop.f32.mrf.mxu1 }
 0x40c   :  { %v1306_v3 = vpop.f32.mrf.mxu0 }
 0x40d   :  { %1360 = vrot.lane.b32.xlu1 %v1248_v1, %s2391_s4  ;;  %1376 = vrot.lane.b32.xlu2 %v1306_v3, %s2392_s7  ;;  %v1587_v1 = vld [vmem:[#allocation11 + $0x178] sm:$0xff]  ;;  %v1580_v3 = vld [vmem:[#allocation11 + $0x140] sm:$0xff] }
 0x410   :  { %v1332_v20 = vpop.f32.mrf.mxu1 }
 0x411   :  { %1378 = vrot.lane.b32.xlu0 %v1332_v20, %s2392_s7  ;;  %v1581_v20 = vld [vmem:[#allocation11 + $0x148] sm:$0xff] }
 0x415   :  { %1346 = vrot.lane.b32.xlu1 %v1216_v63, %s2383_s24  ;;  %v1584_v63 = vld [vmem:[#allocation11 + $0x160] sm:$0xff] }
 0x416   :  { %1608 = vmatpush.msra.mxu2 %v1584_v63 }
 0x418   :  { %1609 = vmatpush.msra.mxu2 %v1580_v3 }
 0x41d   :  { %1348 = vrot.lane.b32.xlu1 %v1219_v16, %s2383_s24  ;;  %v1586_v16 = vld [vmem:[#allocation11 + $0x170] sm:$0xff]  ;;  %s1942_s24 = sshll.u32 %s2983_s8, 4  ;;  %s1943_s24 = int_to_ptr.hbm [resolvable:$true] %s1942_s24 }
 0x41e   :  { %1666 = vmatpush.msrb.mxu0 %v1586_v16 }
 0x43b   :  { %v1343_v5 = vpop.permute.xlu2 %1342 }
 0x43c   :  { %v1386_v44 = vsel %vm644_vm9, %v1129_v6, %v1343_v5  ;;  %v1595_v6 = vld [vmem:[#allocation11 + $0x1b8] sm:$0xff]  ;;  %v1572_v5 = vld [vmem:[#allocation11 + $0x100] sm:$0xff] }
 0x43d   :  { %1693 = vmatpush.msra.mxu1 %v1595_v6  ;;  %v1542_v6 = vld [vmem:[#allocation11 + $0x10] sm:$0xff] }
 0x43f   :  { %1694 = vmatpush.msra.mxu1 %v1591_v14 }
 0x441   :  { %1695 = vmatpush.msra.mxu1 %v1587_v1 }
 0x447   :  { %v1274_v22 = vpop.f32.mrf.mxu3 }
 0x448   :  { %1362 = vrot.lane.b32.xlu2 %v1274_v22, %s2391_s4  ;;  %v1576_v22 = vld [vmem:[#allocation11 + $0x120] sm:$0xff] }
 0x449   :  { %v1335_v59 = vpop.f32.mrf.mxu1  ;;  %1610 = vmatpush.msra.mxu2 %v1576_v22 }
 0x44a   :  { %1380 = vrot.lane.b32.xlu0 %v1335_v59, %s2392_s7  ;;  %v1577_v59 = vld [vmem:[#allocation11 + $0x128] sm:$0xff] }
 0x44b   :  { %1611 = vmatpush.msra.mxu2 %v1572_v5 }
 0x44f   :  { %v1277_v53 = vpop.f32.mrf.mxu3 }
 0x450   :  { %1364 = vrot.lane.b32.xlu2 %v1277_v53, %s2391_s4  ;;  %v1578_v53 = vld [vmem:[#allocation11 + $0x130] sm:$0xff] }
 0x461   :  { %v1359_v24 = vpop.permute.xlu1 %1358 }
 0x462   :  { %v1391_v26 = vsel %vm1390_vm13, %v1386_v44, %v1359_v24  ;;  %v1579_v24 = vld [vmem:[#allocation11 + $0x138] sm:$0xff]  ;;  %v1573_v44 = vld [vmem:[#allocation11 + $0x108] sm:$0xff] }
 0x463   :  { %v1345_v30 = vpop.permute.xlu0 %1344 }
 0x464   :  { %v1387_v8 = vsel %vm644_vm9, %v1132_v12, %v1345_v30  ;;  %v1589_v12 = vld [vmem:[#allocation11 + $0x188] sm:$0xff] }
 0x465   :  { %1636 = vmatpush.msra.mxu3 %v1589_v12  ;;  %v1543_v12 = vld [vmem:[#allocation11 + $0x18] sm:$0xff] }
 0x467   :  { %v1377_v33 = vpop.permute.xlu2 %1376  ;;  %1637 = vmatpush.msra.mxu3 %v1585_v15 }
 0x469   :  { %1638 = vmatpush.msra.mxu3 %v1581_v20 }
 0x46b   :  { %1639 = vmatpush.msra.mxu3 %v1577_v59 }
 0x46d   :  { %1640 = vmatpush.msra.mxu3 %v1573_v44 }
 0x477   :  { %v1375_v18 = vpop.permute.xlu1 %1374 }
 0x478   :  { %v1396_v25 = vsel %vm1395_vm14, %v1391_v26, %v1375_v18  ;;  %v1574_v26 = vld [vmem:[#allocation11 + $0x110] sm:$0xff] }
 0x479   :  { %v2906_v27 = vadd.f32 %v2171_v17, %v1396_v25  ;;  %v1575_v25 = vld [vmem:[#allocation11 + $0x118] sm:$0xff]  ;;  %v1568_v17 = vld [vmem:[#allocation11 + $0xe0] sm:$0xff] }
 0x47a   :  { %1612 = vmatpush.msra.mxu2 %v1568_v17 }
 0x47b   :  { %v1405_v28 = vmul.f32 %v2906_v27, %v2906_v27 }
 0x47d   :  { %1409 = vadd.xlane.f32.xlu1 %v1405_v28  ;;  %v1569_v28 = vld [vmem:[#allocation11 + $0xe8] sm:$0xff] }
 0x47e   :  { %1641 = vmatpush.msra.mxu3 %v1569_v28 }
 0x47f   :  { %v1361_v31 = vpop.permute.xlu1 %1360 }
 0x480   :  { %v1392_v36 = vsel %vm1390_vm13, %v1387_v8, %v1361_v31  ;;  %v1570_v8 = vld [vmem:[#allocation11 + $0xf0] sm:$0xff]  ;;  %v1571_v31 = vld [vmem:[#allocation11 + $0xf8] sm:$0xff] }
 0x481   :  { %v1397_v37 = vsel %vm1395_vm14, %v1392_v36, %v1377_v33  ;;  %v1564_v33 = vld [vmem:[#allocation11 + $0xc0] sm:$0xff]  ;;  %v1565_v36 = vld [vmem:[#allocation11 + $0xc8] sm:$0xff] }
 0x482   :  { %v2913_v35 = vadd.f32 %v2172_v19, %v1397_v37  ;;  %v1566_v37 = vld [vmem:[#allocation11 + $0xd0] sm:$0xff]  ;;  %v1567_v19 = vld [vmem:[#allocation11 + $0xd8] sm:$0xff]  ;;  %1613 = vmatpush.msra.mxu2 %v1564_v33  ;;  %1642 = vmatpush.msra.mxu3 %v1565_v36 }
 0x483   :  { %v1379_v43 = vpop.permute.xlu0 %1378 }
 0x484   :  { %v1406_v40 = vmul.f32 %v2913_v35, %v2913_v35 }
 0x486   :  { %1411 = vadd.xlane.f32.xlu2 %v1406_v40  ;;  %v1560_v40 = vld [vmem:[#allocation11 + $0xa0] sm:$0xff] }
 0x487   :  { %v1347_v42 = vpop.permute.xlu1 %1346  ;;  %1614 = vmatpush.msra.mxu2 %v1560_v40 }
 0x488   :  { %v1388_v38 = vsel %vm644_vm9, %v1158_v21, %v1347_v42  ;;  %v1582_v21 = vld [vmem:[#allocation11 + $0x150] sm:$0xff]  ;;  %v1561_v42 = vld [vmem:[#allocation11 + $0xa8] sm:$0xff] }
 0x489   :  { %1667 = vmatpush.msrb.mxu0 %v1582_v21  ;;  %1643 = vmatpush.msra.mxu3 %v1561_v42 }
 0x48b   :  { %1668 = vmatpush.msrb.mxu0 %v1578_v53 }
 0x48d   :  { %1669 = vmatpush.msrb.mxu0 %v1574_v26 }
 0x48f   :  { %v1349_v51 = vpop.permute.xlu1 %1348  ;;  %1670 = vmatpush.msrb.mxu0 %v1570_v8 }
 0x490   :  { %v1389_v52 = vsel %vm644_vm9, %v1161_v9, %v1349_v51  ;;  %v1583_v9 = vld [vmem:[#allocation11 + $0x158] sm:$0xff]  ;;  %v1553_v51 = vld [vmem:[#allocation11 + $0x68] sm:$0xff] }
 0x491   :  { %1696 = vmatpush.msra.mxu1 %v1583_v9  ;;  %1671 = vmatpush.msrb.mxu0 %v1566_v37 }
 0x493   :  { %1697 = vmatpush.msra.mxu1 %v1579_v24 }
 0x495   :  { %1698 = vmatpush.msra.mxu1 %v1575_v25 }
 0x497   :  { %1699 = vmatpush.msra.mxu1 %v1571_v31 }
 0x499   :  { %1700 = vmatpush.msra.mxu1 %v1567_v19  ;;  %v2945_v19 = vld [vmem:[%s2980_s5] ss:$0 sm:$0xff]  ;;  %s2393_s5 = smov [#allocation14]  }
 0x49a   :  { %s1940_s3 = sshll.u32 %s2393_s5, 4  ;;  %s1941_s3 = int_to_ptr.vmem [resolvable:$true] %s1940_s3 }
 0x4a2   :  { %v1363_v54 = vpop.permute.xlu2 %1362 }
 0x4a3   :  { %v1393_v46 = vsel %vm1390_vm13, %v1388_v38, %v1363_v54  ;;  %v1562_v38 = vld [vmem:[#allocation11 + $0xb0] sm:$0xff]  ;;  %v1563_v54 = vld [vmem:[#allocation11 + $0xb8] sm:$0xff] }
 0x4a4   :  { %v1398_v47 = vsel %vm1395_vm14, %v1393_v46, %v1379_v43  ;;  %v1556_v43 = vld [vmem:[#allocation11 + $0x80] sm:$0xff]  ;;  %v1557_v46 = vld [vmem:[#allocation11 + $0x88] sm:$0xff]  ;;  %1672 = vmatpush.msrb.mxu0 %v1562_v38  ;;  %1701 = vmatpush.msra.mxu1 %v1563_v54 }
 0x4a5   :  { %v2920_v34 = vadd.f32 %v2173_v48, %v1398_v47  ;;  %v1558_v47 = vld [vmem:[#allocation11 + $0x90] sm:$0xff]  ;;  %v1559_v48 = vld [vmem:[#allocation11 + $0x98] sm:$0xff]  ;;  %1615 = vmatpush.msra.mxu2 %v1556_v43  ;;  %1644 = vmatpush.msra.mxu3 %v1557_v46 }
 0x4a6   :  { %1673 = vmatpush.msrb.mxu0 %v1558_v47  ;;  %1702 = vmatpush.msra.mxu1 %v1559_v48 }
 0x4a7   :  { %v1407_v49 = vmul.f32 %v2920_v34, %v2920_v34  ;;  %1645 = vmatpush.msra.mxu3 %v1553_v51 }
 0x4a9   :  { %1413 = vadd.xlane.f32.xlu0 %v1407_v49  ;;  %v1552_v49 = vld [vmem:[#allocation11 + $0x60] sm:$0xff] }
 0x4aa   :  { %v1365_v50 = vpop.permute.xlu2 %1364  ;;  %1616 = vmatpush.msra.mxu2 %v1552_v49 }
 0x4ab   :  { %v1394_v56 = vsel %vm1390_vm13, %v1389_v52, %v1365_v50  ;;  %v1554_v50 = vld [vmem:[#allocation11 + $0x70] sm:$0xff]  ;;  %v1555_v52 = vld [vmem:[#allocation11 + $0x78] sm:$0xff] }
 0x4ac   :  { %1674 = vmatpush.msrb.mxu0 %v1554_v50  ;;  %1703 = vmatpush.msra.mxu1 %v1555_v52 }
 0x4ae   :  { %1675 = vmatpush.msrb.mxu0 %v1550_v32  ;;  %1704 = vmatpush.msra.mxu1 %v1551_v61 }
 0x4b0   :  { %1676 = vmatpush.msrb.mxu0 %v1546_v2  ;;  %1705 = vmatpush.msra.mxu1 %v1547_v41 }
 0x4b2   :  { %1677 = vmatpush.msrb.mxu0 %v1542_v6  ;;  %1706 = vmatpush.msra.mxu1 %v1543_v12 }
 0x4bc   :  { %v1381_v57 = vpop.permute.xlu0 %1380 }
 0x4bd   :  { %v1399_v23 = vsel %vm1395_vm14, %v1394_v56, %v1381_v57 }
 0x4be   :  { %v2927_v55 = vadd.f32 %v2174_v58, %v1399_v23  ;;  %v1548_v23 = vld [vmem:[#allocation11 + $0x40] sm:$0xff]  ;;  %v1549_v58 = vld [vmem:[#allocation11 + $0x48] sm:$0xff] }
 0x4bf   :  { %1617 = vmatpush.msra.mxu2 %v1548_v23  ;;  %1646 = vmatpush.msra.mxu3 %v1549_v58 }
 0x4c0   :  { %v1408_v60 = vmul.f32 %v2927_v55, %v2927_v55 }
 0x4c1   :  { %1618 = vmatpush.msra.mxu2 %v1544_v62  ;;  %1647 = vmatpush.msra.mxu3 %v1545_v0 }
 0x4c2   :  { %1415 = vadd.xlane.f32.xlu1 %v1408_v60 }
 0x4c3   :  { %1619 = vmatpush.msra.mxu2 %v1540_v10  ;;  %1648 = vmatpush.msra.mxu3 %v1541_v11 }
 0x4f0   :  { %v1410_v18 = vpop.xlane.xlu1 %1409 }
 0x4f1   :  { %v2932_v30 = vmul.f32 %v1410_v18, %v2496_v45 }
 0x4f3   :  { %2155 = vrsqrt.f32 %v2932_v30  ;;  %vm1428_vm15 = vcmp.eq.f32.partialorder %v2932_v30, inf  ;;  %v1431_v16 = vand.u32 2147483648, %v2932_v30  ;;  %vm1430_vm0 = vcmp.eq.f32.partialorder %v2932_v30, 0.0 }
 0x4f9   :  { %v2156_v56 = vpop.eup %2155  ;;  %v1412_v57 = vpop.xlane.xlu2 %1411 }
 0x4fa   :  { %v1422_v60 = vmul.f32 %v2156_v56, %v2932_v30  ;;  %v1418_v39 = vmul.f32 %v1412_v57, %v2496_v45 }
 0x4fc   :  { %v1423_v29 = vmul.f32 %v2156_v56, %v1422_v60  ;;  %2157 = vrsqrt.f32 %v1418_v39  ;;  %vm1440_vm1 = vcmp.eq.f32.partialorder %v1418_v39, inf  ;;  %v1443_v24 = vand.u32 2147483648, %v1418_v39 }
 0x4fd   :  { %vm1442_vm2 = vcmp.eq.f32.partialorder %v1418_v39, 0.0 }
 0x4fe   :  { %v1424_v7 = vmul.f32 0.5, %v1423_v29 }
 0x500   :  { %v1425_v4 = vsub.f32 1.5, %v1424_v7 }
 0x502   :  { %v2158_v13 = vpop.eup %2157  ;;  %v1426_v14 = vmul.f32 %v2156_v56, %v1425_v4 }
 0x503   :  { %v1434_v63 = vmul.f32 %v2158_v13, %v1418_v39 }
 0x504   :  { %v1427_v15 = vmul.f32 %v1426_v14, %v2932_v30 }
 0x505   :  { %v1435_v1 = vmul.f32 %v2158_v13, %v1434_v63 }
 0x506   :  { %v1429_v3 = vsel %vm1428_vm15, %v2932_v30, %v1427_v15 }
 0x507   :  { %v1436_v20 = vmul.f32 0.5, %v1435_v1  ;;  %v1432_v21 = vsel %vm1430_vm0, %v1431_v16, %v1429_v3 }
 0x508   :  { %v1469_v9 = vadd.f32 1e-08, %v1432_v21 }
 0x509   :  { %v1437_v22 = vsub.f32 1.5, %v1436_v20 }
 0x50a   :  { %2159 = vrcp.f32 %v1469_v9  ;;  %v1484_v28 = vand.u32 2147483648, %v1469_v9  ;;  %v1482_v30 = vand.u32 2147483647, %v1469_v9  ;;  %vm1478_vm4 = vweird.f32 %v1469_v9 }
 0x50b   :  { %v1438_v59 = vmul.f32 %v2158_v13, %v1437_v22 }
 0x50c   :  { %v1485_v33 = vor.u32 1.1754944e-38, %v1484_v28  ;;  %vm1483_vm6 = vcmp.eq.f32.partialorder %v1482_v30, 8.507059e+37  ;;  %v1767_v28 = vld [vmem:[#allocation13 + $0x78] sm:$0xff] }
 0x50d   :  { %v1439_v53 = vmul.f32 %v1438_v59, %v1418_v39  ;;  %1816 = vmatpush.msrb.mxu2 %v1767_v28  ;;  %v1773_v28 = vld [vmem:[#allocation13 + $0xa8] sm:$0xff] }
 0x50f   :  { %v1441_v5 = vsel %vm1440_vm1, %v1418_v39, %v1439_v53  ;;  %v1815_v53 = vld [vmem:[#allocation13 + $0x1f8] sm:$0xff] }
 0x510   :  { %v2160_v44 = vpop.eup %2159  ;;  %v1444_v26 = vsel %vm1442_vm2, %v1443_v24, %v1441_v5  ;;  %v1798_v24 = vld [vmem:[#allocation13 + $0x170] sm:$0xff]  ;;  %1903 = vmatpush.msrb.mxu1 %v1815_v53  ;;  %v1787_v53 = vld [vmem:[#allocation13 + $0x118] sm:$0xff] }
 0x511   :  { %v1474_v18 = vmul.f32 %v2160_v44, %v1469_v9  ;;  %v1470_v25 = vadd.f32 1e-08, %v1444_v26  ;;  %vm1479_vm3 = vweird.f32 %v2160_v44  ;;  %v1797_v26 = vld [vmem:[#allocation13 + $0x168] sm:$0xff] }
 0x512   :  { %vm1480_vm5 = vmor %vm1478_vm4, %vm1479_vm3 }
 0x513   :  { %v1475_v17 = vsub.f32 1.0, %v1474_v18  ;;  %2161 = vrcp.f32 %v1470_v25  ;;  %v1499_v48 = vand.u32 2147483648, %v1470_v25  ;;  %v1497_v51 = vand.u32 2147483647, %v1470_v25 }
 0x514   :  { %vm1493_vm8 = vweird.f32 %v1470_v25 }
 0x515   :  { %v1476_v8 = vmul.f32 %v2160_v44, %v1475_v17  ;;  %v1500_v52 = vor.u32 1.1754944e-38, %v1499_v48  ;;  %vm1498_vm10 = vcmp.eq.f32.partialorder %v1497_v51, 8.507059e+37  ;;  %v1813_v17 = vld [vmem:[#allocation13 + $0x1e8] sm:$0xff]  ;;  %v1794_v51 = vld [vmem:[#allocation13 + $0x150] sm:$0xff] }
 0x516   :  { %v1765_v48 = vld [vmem:[#allocation13 + $0x68] sm:$0xff] }
 0x517   :  { %v1477_v31 = vadd.f32 %v2160_v44, %v1476_v8  ;;  %v1783_v8 = vld [vmem:[#allocation13 + $0xf8] sm:$0xff] }
 0x518   :  { %1845 = vmatpush.msrb.mxu3 %v1783_v8  ;;  %v1786_v8 = vld [vmem:[#allocation13 + $0x110] sm:$0xff] }
 0x519   :  { %v2162_v36 = vpop.eup %2161  ;;  %v1481_v37 = vsel %vm1480_vm5, %v2160_v44, %v1477_v31  ;;  %v1814_v44 = vld [vmem:[#allocation13 + $0x1f0] sm:$0xff] }
 0x51a   :  { %v1486_v40 = vsel %vm1483_vm6, %v1485_v33, %v1481_v37  ;;  %v1489_v42 = vmul.f32 %v2162_v36, %v1470_v25  ;;  %vm1494_vm7 = vweird.f32 %v2162_v36  ;;  %1904 = vmatpush.msrb.mxu1 %v1814_v44  ;;  %v1812_v37 = vld [vmem:[#allocation13 + $0x1e0] sm:$0xff] }
 0x51b   :  { %v1487_v38 = vmul.f32 %v1486_v40, %v2906_v27  ;;  %vm1495_vm9 = vmor %vm1493_vm8, %vm1494_vm7 }
 0x51c   :  { %v1414_v54 = vpop.xlane.xlu0 %1413  ;;  %v1490_v43 = vsub.f32 1.0, %v1489_v42  ;;  %1905 = vmatpush.msrb.mxu1 %v1813_v17  ;;  %v1766_v42 = vld [vmem:[#allocation13 + $0x70] sm:$0xff]  ;;  %v1757_v17 = vld [vmem:[#allocation13 + $0x28] sm:$0xff] }
 0x51d   :  { %v1419_v46 = vmul.f32 %v1414_v54, %v2496_v45  ;;  %v1536_v47 = vmul.f32 %v2945_v19, %v1487_v38  ;;  %v1782_v38 = vld [vmem:[#allocation13 + $0xf0] sm:$0xff]  ;;  %1817 = vmatpush.msrb.mxu2 %v1766_v42  ;;  %v1784_v42 = vld [vmem:[#allocation13 + $0x100] sm:$0xff] }
 0x51e   :  { %v1491_v49 = vmul.f32 %v2162_v36, %v1490_v43  ;;  %v1795_v43 = vld [vmem:[#allocation13 + $0x158] sm:$0xff]  ;;  %1906 = vmatpush.msrb.mxu1 %v1812_v37  ;;  %1846 = vmatpush.msrb.mxu3 %v1782_v38  ;;  %v1801_v37 = vld [vmem:[#allocation13 + $0x188] sm:$0xff]  ;;  %v1800_v38 = vld [vmem:[#allocation13 + $0x180] sm:$0xff] }
 0x51f   :  { %2163 = vrsqrt.f32 %v1419_v46  ;;  %1620 = vmatmul.f32.vlgmr.msra.gmra.mxu2 %v1536_v47  ;;  %1649 = vmatmul.f32.vlgmr.msra.gmra.mxu3 %v1536_v47  ;;  %vm1452_vm11 = vcmp.eq.f32.partialorder %v1419_v46, inf  ;;  %v1455_v2 = vand.u32 2147483648, %v1419_v46  ;;  %vm1454_vm12 = vcmp.eq.f32.partialorder %v1419_v46, 0.0 }
 0x520   :  { %1678 = vmatmul.f32.vlgmr.msrb.gmra.mxu0 %v1536_v47  ;;  %1707 = vmatmul.f32.vlgmr.msra.gmra.mxu1 %v1536_v47  ;;  %v1492_v50 = vadd.f32 %v2162_v36, %v1491_v49  ;;  %v1781_v49 = vld [vmem:[#allocation13 + $0xe8] sm:$0xff] }
 0x521   :  { %1818 = vmatpush.msrb.mxu2 %v1765_v48  ;;  %1847 = vmatpush.msrb.mxu3 %v1781_v49  ;;  %v1752_v48 = vld [vmem:[#allocation13] sm:$0xff] }
 0x522   :  { %v1496_v56 = vsel %vm1495_vm9, %v2162_v36, %v1492_v50  ;;  %v1796_v36 = vld [vmem:[#allocation13 + $0x160] sm:$0xff]  ;;  %v1810_v50 = vld [vmem:[#allocation13 + $0x1d0] sm:$0xff] }
 0x523   :  { %v1501_v57 = vsel %vm1498_vm10, %v1500_v52, %v1496_v56  ;;  %v1764_v52 = vld [vmem:[#allocation13 + $0x60] sm:$0xff] }
 0x524   :  { %v1502_v23 = vmul.f32 %v1501_v57, %v2913_v35  ;;  %v1780_v56 = vld [vmem:[#allocation13 + $0xe0] sm:$0xff]  ;;  %v1793_v57 = vld [vmem:[#allocation13 + $0x148] sm:$0xff]  ;;  %1819 = vmatpush.msrb.mxu2 %v1764_v52 }
 0x525   :  { %v2164_v58 = vpop.eup %2163  ;;  %1848 = vmatpush.msrb.mxu3 %v1780_v56  ;;  %v1768_v49 = vld [vmem:[#allocation13 + $0x80] sm:$0xff] }
 0x526   :  { %v1446_v60 = vmul.f32 %v2164_v58, %v1419_v46  ;;  %v1537_v39 = vmul.f32 %v2945_v19, %v1502_v23  ;;  %v1809_v23 = vld [vmem:[#allocation13 + $0x1c8] sm:$0xff] }
 0x528   :  { %v1447_v32 = vmul.f32 %v2164_v58, %v1446_v60  ;;  %1623 = vmatmul.f32.gmra.mxu2 %v1537_v39  ;;  %1652 = vmatmul.f32.gmra.mxu3 %v1537_v39  ;;  %v1779_v60 = vld [vmem:[#allocation13 + $0xd8] sm:$0xff] }
 0x529   :  { %1681 = vmatmul.f32.gmra.mxu0 %v1537_v39  ;;  %1710 = vmatmul.f32.gmra.mxu1 %v1537_v39  ;;  %v1792_v39 = vld [vmem:[#allocation13 + $0x140] sm:$0xff] }
 0x52a   :  { %v1448_v61 = vmul.f32 0.5, %v1447_v32  ;;  %v1808_v32 = vld [vmem:[#allocation13 + $0x1c0] sm:$0xff]  ;;  %1849 = vmatpush.msrb.mxu3 %v1779_v60 }
 0x52c   :  { %v1449_v62 = vsub.f32 1.5, %v1448_v61  ;;  %v1762_v61 = vld [vmem:[#allocation13 + $0x50] sm:$0xff] }
 0x52e   :  { %v1450_v0 = vmul.f32 %v2164_v58, %v1449_v62  ;;  %v1763_v58 = vld [vmem:[#allocation13 + $0x58] sm:$0xff]  ;;  %v1778_v62 = vld [vmem:[#allocation13 + $0xd0] sm:$0xff] }
 0x52f   :  { %1820 = vmatpush.msrb.mxu2 %v1763_v58  ;;  %1850 = vmatpush.msrb.mxu3 %v1778_v62 }
 0x530   :  { %v1451_v29 = vmul.f32 %v1450_v0, %v1419_v46  ;;  %v1791_v0 = vld [vmem:[#allocation13 + $0x138] sm:$0xff] }
 0x531   :  { %1821 = vmatpush.msrb.mxu2 %v1762_v61 }
 0x532   :  { %v1453_v41 = vsel %vm1452_vm11, %v1419_v46, %v1451_v29  ;;  %v1811_v46 = vld [vmem:[#allocation13 + $0x1d8] sm:$0xff] }
 0x533   :  { %v1456_v7 = vsel %vm1454_vm12, %v1455_v2, %v1453_v41  ;;  %1907 = vmatpush.msrb.mxu1 %v1811_v46  ;;  %v1807_v29 = vld [vmem:[#allocation13 + $0x1b8] sm:$0xff]  ;;  %v1761_v41 = vld [vmem:[#allocation13 + $0x48] sm:$0xff] }
 0x534   :  { %v1471_v10 = vadd.f32 1e-08, %v1456_v7  ;;  %v1777_v7 = vld [vmem:[#allocation13 + $0xc8] sm:$0xff]  ;;  %1822 = vmatpush.msrb.mxu2 %v1761_v41 }
 0x535   :  { %v1416_v11 = vpop.xlane.xlu1 %1415  ;;  %1908 = vmatpush.msrb.mxu1 %v1810_v50  ;;  %1851 = vmatpush.msrb.mxu3 %v1777_v7  ;;  %v1753_v46 = vld [vmem:[#allocation13 + $0x8] sm:$0xff] }
 0x536   :  { %v1420_v6 = vmul.f32 %v1416_v11, %v2496_v45  ;;  %2165 = vrcp.f32 %v1471_v10  ;;  %v1514_v15 = vand.u32 2147483648, %v1471_v10  ;;  %v1512_v3 = vand.u32 2147483647, %v1471_v10  ;;  %v1799_v45 = vld [vmem:[#allocation13 + $0x178] sm:$0xff]  ;;  %v1790_v11 = vld [vmem:[#allocation13 + $0x130] sm:$0xff] }
 0x537   :  { %vm1508_vm14 = vweird.f32 %v1471_v10  ;;  %1874 = vmatpush.msra.mxu0 %v1799_v45  ;;  %1909 = vmatpush.msrb.mxu1 %v1809_v23 }
 0x538   :  { %2167 = vrsqrt.f32 %v1420_v6  ;;  %v1515_v9 = vor.u32 1.1754944e-38, %v1514_v15  ;;  %vm1513_vm0 = vcmp.eq.f32.partialorder %v1512_v3, 8.507059e+37  ;;  %vm1464_vm1 = vcmp.eq.f32.partialorder %v1420_v6, inf }
 0x539   :  { %1875 = vmatpush.msra.mxu0 %v1798_v24  ;;  %v1467_v33 = vand.u32 2147483648, %v1420_v6  ;;  %vm1466_vm2 = vcmp.eq.f32.partialorder %v1420_v6, 0.0  ;;  %1910 = vmatpush.msrb.mxu1 %v1808_v32  ;;  %v1803_v24 = vld [vmem:[#allocation13 + $0x198] sm:$0xff] }
 0x53b   :  { %1876 = vmatpush.msra.mxu0 %v1797_v26  ;;  %1911 = vmatpush.msrb.mxu1 %v1807_v29 }
 0x53c   :  { %v2166_v4 = vpop.eup %2165 }
 0x53d   :  { %v1504_v12 = vmul.f32 %v2166_v4, %v1471_v10  ;;  %vm1509_vm13 = vweird.f32 %v2166_v4  ;;  %1877 = vmatpush.msra.mxu0 %v1796_v36  ;;  %v1785_v36 = vld [vmem:[#allocation13 + $0x108] sm:$0xff] }
 0x53e   :  { %v2168_v13 = vpop.eup %2167  ;;  %vm1510_vm15 = vmor %vm1508_vm14, %vm1509_vm13 }
 0x53f   :  { %v1458_v14 = vmul.f32 %v2168_v13, %v1420_v6  ;;  %v1505_v63 = vsub.f32 1.0, %v1504_v12  ;;  %1878 = vmatpush.msra.mxu0 %v1795_v43  ;;  %v1776_v12 = vld [vmem:[#allocation13 + $0xc0] sm:$0xff]  ;;  %v1770_v43 = vld [vmem:[#allocation13 + $0x90] sm:$0xff] }
 0x540   :  { %1852 = vmatpush.msrb.mxu3 %v1776_v12 }
 0x541   :  { %v1459_v16 = vmul.f32 %v2168_v13, %v1458_v14  ;;  %v1506_v1 = vmul.f32 %v2166_v4, %v1505_v63  ;;  %1879 = vmatpush.msra.mxu0 %v1794_v51  ;;  %v1789_v14 = vld [vmem:[#allocation13 + $0x128] sm:$0xff] }
 0x542   :  { %v1805_v63 = vld [vmem:[#allocation13 + $0x1a8] sm:$0xff] }
 0x543   :  { %v1460_v20 = vmul.f32 0.5, %v1459_v16  ;;  %v1507_v21 = vadd.f32 %v2166_v4, %v1506_v1  ;;  %1880 = vmatpush.msra.mxu0 %v1793_v57  ;;  %v1759_v16 = vld [vmem:[#allocation13 + $0x38] sm:$0xff] }
 0x544   :  { %v1775_v1 = vld [vmem:[#allocation13 + $0xb8] sm:$0xff] }
 0x545   :  { %v1461_v22 = vsub.f32 1.5, %v1460_v20  ;;  %v1511_v59 = vsel %vm1510_vm15, %v2166_v4, %v1507_v21  ;;  %1881 = vmatpush.msra.mxu0 %v1792_v39  ;;  %v1760_v4 = vld [vmem:[#allocation13 + $0x40] sm:$0xff]  ;;  %1853 = vmatpush.msrb.mxu3 %v1775_v1 }
 0x546   :  { %v1516_v5 = vsel %vm1513_vm0, %v1515_v9, %v1511_v59  ;;  %1823 = vmatpush.msrb.mxu2 %v1760_v4  ;;  %v1788_v21 = vld [vmem:[#allocation13 + $0x120] sm:$0xff]  ;;  %v1774_v59 = vld [vmem:[#allocation13 + $0xb0] sm:$0xff] }
 0x547   :  { %v1462_v18 = vmul.f32 %v2168_v13, %v1461_v22  ;;  %v1517_v25 = vmul.f32 %v1516_v5, %v2920_v34  ;;  %1882 = vmatpush.msra.mxu0 %v1791_v0  ;;  %v1804_v9 = vld [vmem:[#allocation13 + $0x1a0] sm:$0xff]  ;;  %v1758_v22 = vld [vmem:[#allocation13 + $0x30] sm:$0xff]  ;;  %1854 = vmatpush.msrb.mxu3 %v1774_v59 }
 0x548   :  { %1824 = vmatpush.msrb.mxu2 %v1759_v16 }
 0x549   :  { %v1463_v30 = vmul.f32 %v1462_v18, %v1420_v6  ;;  %v1538_v31 = vmul.f32 %v2945_v19, %v1517_v25  ;;  %1883 = vmatpush.msra.mxu0 %v1790_v11  ;;  %1855 = vmatpush.msrb.mxu3 %v1773_v28 }
 0x54a   :  { %1825 = vmatpush.msrb.mxu2 %v1758_v22 }
 0x54b   :  { %v1465_v40 = vsel %vm1464_vm1, %v1420_v6, %v1463_v30  ;;  %1626 = vmatmul.f32.gmra.mxu2 %v1538_v31  ;;  %1655 = vmatmul.f32.gmra.mxu3 %v1538_v31  ;;  %v1806_v6 = vld [vmem:[#allocation13 + $0x1b0] sm:$0xff] }
 0x54c   :  { %1684 = vmatmul.f32.gmra.mxu0 %v1538_v31  ;;  %1713 = vmatmul.f32.gmra.mxu1 %v1538_v31  ;;  %v1468_v54 = vsel %vm1466_vm2, %v1467_v33, %v1465_v40  ;;  %v1802_v30 = vld [vmem:[#allocation13 + $0x190] sm:$0xff]  ;;  %v1756_v31 = vld [vmem:[#allocation13 + $0x20] sm:$0xff]  ;;  %v1755_v40 = vld [vmem:[#allocation13 + $0x18] sm:$0xff] }
 0x54d   :  { %v2955_v47 = vadd.f32 1e-08, %v1468_v54  ;;  %1912 = vmatpush.msrb.mxu1 %v1806_v6  ;;  %1884 = vmatpush.msra.mxu0 %v1789_v14  ;;  %v1772_v33 = vld [vmem:[#allocation13 + $0xa0] sm:$0xff]  ;;  %v1754_v54 = vld [vmem:[#allocation13 + $0x10] sm:$0xff] }
 0x54e   :  { %1826 = vmatpush.msrb.mxu2 %v1757_v17  ;;  %1856 = vmatpush.msrb.mxu3 %v1772_v33 }
 0x54f   :  { %2169 = vrcp.f32 %v2955_v47  ;;  %v1529_v15 = vand.u32 2147483648, %v2955_v47  ;;  %v1527_v20 = vand.u32 2147483647, %v2955_v47  ;;  %1913 = vmatpush.msrb.mxu1 %v1805_v63  ;;  %vm1523_vm4 = vweird.f32 %v2955_v47  ;;  %1885 = vmatpush.msra.mxu0 %v1788_v21 }
 0x550   :  { %1827 = vmatpush.msrb.mxu2 %v1756_v31 }
 0x551   :  { %v1530_v5 = vor.u32 1.1754944e-38, %v1529_v15  ;;  %1914 = vmatpush.msrb.mxu1 %v1804_v9  ;;  %vm1528_vm6 = vcmp.eq.f32.partialorder %v1527_v20, 8.507059e+37  ;;  %1886 = vmatpush.msra.mxu0 %v1787_v53 }
 0x552   :  { %1828 = vmatpush.msrb.mxu2 %v1755_v40 }
 0x553   :  { %1915 = vmatpush.msrb.mxu1 %v1803_v24  ;;  %1887 = vmatpush.msra.mxu0 %v1786_v8 }
 0x554   :  { %1829 = vmatpush.msrb.mxu2 %v1754_v54 }
 0x555   :  { %v2170_v2 = vpop.eup %2169  ;;  %1916 = vmatpush.msrb.mxu1 %v1802_v30  ;;  %1888 = vmatpush.msra.mxu0 %v1785_v36 }
 0x556   :  { %v1519_v10 = vmul.f32 %v2170_v2, %v2955_v47  ;;  %vm1524_vm3 = vweird.f32 %v2170_v2  ;;  %v1769_v47 = vld [vmem:[#allocation13 + $0x88] sm:$0xff]  ;;  %1830 = vmatpush.msrb.mxu2 %v1753_v46 }
 0x557   :  { %vm1525_vm5 = vmor %vm1523_vm4, %vm1524_vm3  ;;  %1917 = vmatpush.msrb.mxu1 %v1801_v37  ;;  %1889 = vmatpush.msra.mxu0 %v1784_v42 }
 0x558   :  { %v1520_v13 = vsub.f32 1.0, %v1519_v10  ;;  %1831 = vmatpush.msrb.mxu2 %v1752_v48 }
 0x559   :  { %1918 = vmatpush.msrb.mxu1 %v1800_v38 }
 0x55a   :  { %v1521_v3 = vmul.f32 %v2170_v2, %v1520_v13 }
 0x55c   :  { %v1522_v45 = vadd.f32 %v2170_v2, %v1521_v3 }
 0x55e   :  { %v1526_v44 = vsel %vm1525_vm5, %v2170_v2, %v1522_v45 }
 0x55f   :  { %v1531_v26 = vsel %vm1528_vm6, %v1530_v5, %v1526_v44 }
 0x560   :  { %v1532_v18 = vmul.f32 %v1531_v26, %v2927_v55 }
 0x562   :  { %v1539_v25 = vmul.f32 %v2945_v19, %v1532_v18  ;;  %v1771_v19 = vld [vmem:[#allocation13 + $0x98] sm:$0xff] }
 0x563   :  { %1857 = vmatpush.msrb.mxu3 %v1771_v19 }
 0x564   :  { %1629 = vmatmul.f32.gmra.mxu2 %v1539_v25  ;;  %1658 = vmatmul.f32.gmra.mxu3 %v1539_v25 }
 0x565   :  { %1687 = vmatmul.f32.gmra.mxu0 %v1539_v25  ;;  %1716 = vmatmul.f32.gmra.mxu1 %v1539_v25 }
 0x566   :  { %1858 = vmatpush.msrb.mxu3 %v1770_v43 }
 0x568   :  { %1859 = vmatpush.msrb.mxu3 %v1769_v47 }
 0x56a   :  { %1860 = vmatpush.msrb.mxu3 %v1768_v49 }
 0x59d   :  { %v1679_v51 = vpop.f32.mrf.mxu0  ;;  %v1708_v50 = vpop.f32.mrf.mxu1 }
 0x59e   :  { %v1722_v52 = vmax.f32 %v1679_v51, 0.0  ;;  %v1723_v56 = vmax.f32 %v1708_v50, 0.0 }
 0x5a0   :  { %v1738_v57 = vmul.f32 %v1722_v52, %v1722_v52  ;;  %v1739_v23 = vmul.f32 %v1723_v56, %v1723_v56 }
 0x5a2   :  { %1890 = vmatmul.f32.vlgmr.msra.gmra.mxu0 %v1738_v57  ;;  %1919 = vmatmul.f32.vlgmr.msrb.gmra.mxu1 %v1739_v23  ;;  %v1621_v58 = vpop.f32.mrf.mxu2  ;;  %v1650_v60 = vpop.f32.mrf.mxu3 }
 0x5a3   :  { %v1720_v39 = vmax.f32 %v1621_v58, 0.0  ;;  %v1721_v32 = vmax.f32 %v1650_v60, 0.0 }
 0x5a5   :  { %v1736_v61 = vmul.f32 %v1720_v39, %v1720_v39  ;;  %v1737_v62 = vmul.f32 %v1721_v32, %v1721_v32 }
 0x5a6   :  { %v1682_v0 = vpop.f32.mrf.mxu0  ;;  %v1711_v29 = vpop.f32.mrf.mxu1 }
 0x5a7   :  { %v1726_v2 = vmax.f32 %v1682_v0, 0.0  ;;  %v1727_v41 = vmax.f32 %v1711_v29, 0.0  ;;  %1832 = vmatmul.f32.vlgmr.msrb.gmra.mxu2 %v1736_v61  ;;  %1861 = vmatmul.f32.vlgmr.msrb.gmra.mxu3 %v1737_v62 }
 0x5a9   :  { %v1742_v7 = vmul.f32 %v1726_v2, %v1726_v2  ;;  %v1743_v10 = vmul.f32 %v1727_v41, %v1727_v41 }
 0x5ab   :  { %1893 = vmatmul.f32.gmra.mxu0 %v1742_v7  ;;  %1922 = vmatmul.f32.gmra.mxu1 %v1743_v10  ;;  %v1624_v11 = vpop.f32.mrf.mxu2  ;;  %v1653_v6 = vpop.f32.mrf.mxu3 }
 0x5ac   :  { %v1724_v4 = vmax.f32 %v1624_v11, 0.0  ;;  %v1725_v12 = vmax.f32 %v1653_v6, 0.0 }
 0x5ae   :  { %v1740_v13 = vmul.f32 %v1724_v4, %v1724_v4  ;;  %v1741_v14 = vmul.f32 %v1725_v12, %v1725_v12 }
 0x5b0   :  { %1835 = vmatmul.f32.gmra.mxu2 %v1740_v13  ;;  %1864 = vmatmul.f32.gmra.mxu3 %v1741_v14 }
 0x5c9   :  { %v1685_v63 = vpop.f32.mrf.mxu0  ;;  %v1714_v15 = vpop.f32.mrf.mxu1 }
 0x5ca   :  { %v1730_v16 = vmax.f32 %v1685_v63, 0.0  ;;  %v1731_v1 = vmax.f32 %v1714_v15, 0.0 }
 0x5cc   :  { %v1746_v3 = vmul.f32 %v1730_v16, %v1730_v16  ;;  %v1747_v20 = vmul.f32 %v1731_v1, %v1731_v1 }
 0x5ce   :  { %1896 = vmatmul.f32.gmra.mxu0 %v1746_v3  ;;  %1925 = vmatmul.f32.gmra.mxu1 %v1747_v20  ;;  %v1627_v21 = vpop.f32.mrf.mxu2  ;;  %v1656_v9 = vpop.f32.mrf.mxu3 }
 0x5cf   :  { %v1728_v22 = vmax.f32 %v1627_v21, 0.0  ;;  %v1729_v59 = vmax.f32 %v1656_v9, 0.0 }
 0x5d1   :  { %v1744_v45 = vmul.f32 %v1728_v22, %v1728_v22  ;;  %v1745_v53 = vmul.f32 %v1729_v59, %v1729_v59 }
 0x5d3   :  { %1838 = vmatmul.f32.gmra.mxu2 %v1744_v45  ;;  %1867 = vmatmul.f32.gmra.mxu3 %v1745_v53 }
 0x5e2   :  { %v1688_v24 = vpop.f32.mrf.mxu0  ;;  %v1717_v5 = vpop.f32.mrf.mxu1 }
 0x5e3   :  { %v1734_v44 = vmax.f32 %v1688_v24, 0.0  ;;  %v1735_v26 = vmax.f32 %v1717_v5, 0.0 }
 0x5e5   :  { %v1750_v18 = vmul.f32 %v1734_v44, %v1734_v44  ;;  %v1751_v25 = vmul.f32 %v1735_v26, %v1735_v26 }
 0x5e7   :  { %1899 = vmatmul.f32.gmra.mxu0 %v1750_v18  ;;  %1928 = vmatmul.f32.gmra.mxu1 %v1751_v25  ;;  %v1630_v17 = vpop.f32.mrf.mxu2  ;;  %v1659_v28 = vpop.f32.mrf.mxu3 }
 0x5e8   :  { %v1732_v8 = vmax.f32 %v1630_v17, 0.0  ;;  %v1733_v30 = vmax.f32 %v1659_v28, 0.0 }
 0x5ea   :  { %v1748_v31 = vmul.f32 %v1732_v8, %v1732_v8  ;;  %v1749_v33 = vmul.f32 %v1733_v30, %v1733_v30 }
 0x5ec   :  { %1841 = vmatmul.f32.gmra.mxu2 %v1748_v31  ;;  %1870 = vmatmul.f32.gmra.mxu3 %v1749_v33 }
 0x61f   :  { %v1891_v19 = vpop.f32.mrf.mxu0  ;;  %v1920_v38 = vpop.f32.mrf.mxu1 }
 0x628   :  { %v1894_v51 = vpop.f32.mrf.mxu0  ;;  %v1923_v52 = vpop.f32.mrf.mxu1 }
 0x62a   :  { %v1833_v36 = vpop.f32.mrf.mxu2  ;;  %v1862_v40 = vpop.f32.mrf.mxu3 }
 0x62b   :  { %v1834_v37 = vadd.f32 %v1833_v36, %v2906_v27 }
 0x62d   :  { %v1863_v42 = vadd.f32 %v1862_v40, %v1834_v37 }
 0x62f   :  { %v1892_v54 = vadd.f32 %v1891_v19, %v1863_v42 }
 0x631   :  { %v1921_v43 = vadd.f32 %v1920_v38, %v1892_v54 }
 0x633   :  { %1932 = vst [vmem:[#allocation14] sm:$0xff] %v1921_v43  ;;  %v1836_v46 = vpop.f32.mrf.mxu2  ;;  %v1865_v48 = vpop.f32.mrf.mxu3 }
 0x634   :  { %v1837_v47 = vadd.f32 %v1836_v46, %v2913_v35 }
 0x636   :  { %v1866_v49 = vadd.f32 %v1865_v48, %v1837_v47 }
 0x638   :  { %v1895_v50 = vadd.f32 %v1894_v51, %v1866_v49 }
 0x63a   :  { %v1924_v56 = vadd.f32 %v1923_v52, %v1895_v50 }
 0x63c   :  { %1933 = vst [vmem:[#allocation14 + $0x8] sm:$0xff] %v1924_v56 }
 0x64b   :  { %v1897_v60 = vpop.f32.mrf.mxu0  ;;  %v1926_v32 = vpop.f32.mrf.mxu1 }
 0x656   :  { %v1839_v57 = vpop.f32.mrf.mxu2  ;;  %v1868_v23 = vpop.f32.mrf.mxu3 }
 0x657   :  { %v1840_v27 = vadd.f32 %v1839_v57, %v2920_v34 }
 0x659   :  { %v1869_v58 = vadd.f32 %v1868_v23, %v1840_v27 }
 0x65b   :  { %v1898_v39 = vadd.f32 %v1897_v60, %v1869_v58 }
 0x65d   :  { %v1927_v61 = vadd.f32 %v1926_v32, %v1898_v39 }
 0x65f   :  { %1934 = vst [vmem:[#allocation14 + $0x10] sm:$0xff] %v1927_v61 }
 0x664   :  { %v1900_v2 = vpop.f32.mrf.mxu0  ;;  %v1929_v41 = vpop.f32.mrf.mxu1 }
 0x66f   :  { %v1842_v62 = vpop.f32.mrf.mxu2  ;;  %v1871_v0 = vpop.f32.mrf.mxu3 }
 0x670   :  { %v1843_v35 = vadd.f32 %v1842_v62, %v2927_v55 }
 0x672   :  { %v1872_v29 = vadd.f32 %v1871_v0, %v1843_v35 }
 0x674   :  { %v1901_v34 = vadd.f32 %v1900_v2, %v1872_v29 }
 0x676   :  { %v1930_v7 = vadd.f32 %v1929_v41, %v1901_v34 }
 0x678   :  { %1935 = vst [vmem:[#allocation14 + $0x18] sm:$0xff] %v1930_v7 }
 0x679   :  { %1948 = dma.vmem_to_hbm [thread:$0]  %s1941_s3, 512, %s1943_s24, [#allocation4], %s2379_s1, %s2379_s1, %s2380_s18  }
 0x67a   :  { %2375 = dma.done.wait [#allocation4], 512  }
 0x67b   :  { %2376 = vsyncadd [#allocation4], 4294966784 }
 0x67c   :  { %1953 = vsyncpa [#allocation3], 1 }
 0x67d   :  { %1954 = vsyncpa [#allocation6], 1 }
 0x67e   :  { %1955 = vsyncpa [#allocation9], 1 }
 0x67f   :  { %1956 = vsyncpa [#allocation12], 1 }
 0x680   :  { %1957 = vsyncpa [#allocation4], 1 }

</bundles_post_ra>
